<compile_context>
chip_gen: v7x
topology: tpu7x:2x2x1
jax: 0.10.0
libtpu: 0.0.40
codegen_flags: <defaults>
</compile_context>

<pallas_src>
import functools
import math

import jax
import jax.numpy as jnp
from jax.experimental import pallas as pl
from jax.experimental.pallas import tpu as pltpu


# ----------------------------------------------------------------------------
# helpers
# ----------------------------------------------------------------------------
def _round_up(v, m):
    return ((v + m - 1) // m) * m


def _act(y, slope):
    # Static (trace-time) branch on the activation slope.
    if slope == 1.0:
        return y
    if slope == 0.0:
        return jnp.maximum(y, 0.0)
    return jnp.where(y >= 0, y, slope * y)       # leaky ReLU


def _compiler_params():
    # Budget scoped VMEM against the actual chip (v5e/v6e: 128 MiB, v7x: 64 MiB
    # physical). Whole-image blocks + resident packed weights stay well under this
    # at WideResNet sizes; the default scoped limit already covers the demo shapes.
    try:
        vmem_limit = int(pltpu.get_tpu_info().vmem_capacity_bytes * 3 // 4)
    except Exception:
        vmem_limit = None
    return pltpu.CompilerParams(dimension_semantics=("parallel",),
                                vmem_limit_bytes=vmem_limit)


def _phase_split_padded(x, stride):
    """Spatially pad (pad=1) an NHWC tensor and split into stride*stride phases.

    Returns xp of shape (N, stride*stride, Hh, Wh, C) with
        xp[n, (r % s)*s + (c % s), r // s, c // s, ch] == pad(x)[n, r, c, ch]
    so every 3x3/stride tap window is a *unit-stride* static slice of one phase:
        pad(x)[s*oh+kh, s*ow+kw] == xp[(kh%s)*s + kw%s, oh + kh//s, ow + kw//s].
    This keeps the in-kernel im2col free of strided/gather loads and removes the
    9x HBM patch materialization (cost: one same-size XLA copy only when s > 1).
    """
    N, H, W, C = x.shape
    xp = jnp.pad(x, ((0, 0), (1, 1), (1, 1), (0, 0)))
    Hp, Wp = H + 2, W + 2
    if stride == 1:
        return xp.reshape(N, 1, Hp, Wp, C)
    Hp2, Wp2 = _round_up(Hp, stride), _round_up(Wp, stride)
    xp = jnp.pad(xp, ((0, 0), (0, Hp2 - Hp), (0, Wp2 - Wp), (0, 0)))
    xp = xp.reshape(N, Hp2 // stride, stride, Wp2 // stride, stride, C)
    xp = jnp.transpose(xp, (0, 2, 4, 1, 3, 5))
    return xp.reshape(N, stride * stride, Hp2 // stride, Wp2 // stride, C)


def _conv3x3_taps(a, w_ref, stride, Ho, Wo):
    """In-kernel im2col: 9-tap reduction via accumulating MXU matmuls.

    a:     (stride*stride, Hh, Wh, Cin) bf16, phase-split + already activated.
    w_ref: (9, Cin, Cout) bf16 VMEM-resident packed weights (HWIO tap order).
    Returns the (Ho*Wo, Cout) f32 convolution result.
    """
    Cin = a.shape[-1]
    Cout = w_ref.shape[-1]
    acc = jnp.zeros((Ho * Wo, Cout), jnp.float32)
    for kh in range(3):
        for kw in range(3):
            win = a[(kh % stride) * stride + (kw % stride),
                    kh // stride:kh // stride + Ho,
                    kw // stride:kw // stride + Wo, :]
            acc = acc + jnp.dot(win.reshape(Ho * Wo, Cin), w_ref[kh * 3 + kw],
                                preferred_element_type=jnp.float32)
    return acc


# ----------------------------------------------------------------------------
# kernels (one whole image per grid step)
# ----------------------------------------------------------------------------
def _conv1_kernel(x_ref, m_ref, w_ref, s1_ref, t1_ref, s2_ref, t2_ref, o_ref, *,
                  stride, Ho, Wo, slope):
    """leaky_relu(bn1(x)) -> conv1(stride) -> leaky_relu(bn2(.)).

    The interior mask zeros the halo of the *activated* input (conv pads the
    post-activation tensor with zeros). Output is written already spatially
    padded (zero halo) in bf16 so conv2 consumes it directly.
    """
    x = x_ref[0].astype(jnp.float32)                          # (P, Hh, Wh, Cin)
    a = _act(x * s1_ref[0] + t1_ref[0], slope) * m_ref[0]     # bn1 + act, halo -> 0
    a = a.astype(jnp.bfloat16)                                # MXU operands in bf16
    y = _conv3x3_taps(a, w_ref, stride, Ho, Wo)               # f32 accumulation
    y = _act(y * s2_ref[...] + t2_ref[...], slope)            # bn2 + act epilogue
    o_ref[...] = jnp.zeros(o_ref.shape, o_ref.dtype)          # zero halo
    o_ref[0, 1:1 + Ho, 1:1 + Wo, :] = y.reshape(Ho, Wo, -1).astype(o_ref.dtype)


def _conv2_kernel(h_ref, w_ref, r_ref, o_ref, *, Ho, Wo):
    """conv2 (3x3, stride 1) on the pre-activated, pre-padded intermediate with
    the shortcut residual add fused into the epilogue."""
    y = _conv3x3_taps(h_ref[...], w_ref, 1, Ho, Wo)
    res = r_ref[0].astype(jnp.float32).reshape(Ho * Wo, -1)
    o_ref[0] = (y + res).reshape(Ho, Wo, -1).astype(o_ref.dtype)


# ----------------------------------------------------------------------------
# wrappers
# ----------------------------------------------------------------------------
def _bn_affine(bn, eps):
    s = bn["gamma"] / jnp.sqrt(bn["var"] + eps)
    t = bn["beta"] - bn["mean"] * s
    return s.astype(jnp.float32), t.astype(jnp.float32)


def conv1_bn_act(x, w, bn1, bn2, stride, slope, eps=1e-5):
    """x: (N,H,W,Cin) f32 -> leaky_relu(bn2(conv1(leaky_relu(bn1(x)), stride))),
    returned spatially padded: (N, Ho+2, Wo+2, Cout) bf16."""
    N, H, W, Cin = x.shape
    Cout = w.shape[-1]
    Ho = (H - 1) // stride + 1
    Wo = (W - 1) // stride + 1

    s1, t1 = _bn_affine(bn1, eps)
    s2, t2 = _bn_affine(bn2, eps)
    # Pre-packed weights (9, Cin, Cout) bf16; params are closed-over constants so
    # XLA constant-folds this once (no per-call cast/copy).
    w_pk = w.reshape(9, Cin, Cout).astype(jnp.bfloat16)

    x_ph = _phase_split_padded(x.astype(jnp.float32), stride)
    # Interior mask in the same phase-split layout (1 inside the image, 0 on halo).
    mask = _phase_split_padded(jnp.ones((1, H, W, 1), jnp.float32), stride)
    _, P, Hh, Wh, _ = x_ph.shape

    kernel = functools.partial(_conv1_kernel, stride=stride, Ho=Ho, Wo=Wo, slope=slope)
    return pl.pallas_call(
        kernel,
        out_shape=jax.ShapeDtypeStruct((N, Ho + 2, Wo + 2, Cout), jnp.bfloat16),
        grid_spec=pltpu.PrefetchScalarGridSpec(
            num_scalar_prefetch=0,
            grid=(N,),
            in_specs=[
                pl.BlockSpec((1, P, Hh, Wh, Cin), lambda n: (n, 0, 0, 0, 0)),
                pl.BlockSpec((1, P, Hh, Wh, 1), lambda n: (0, 0, 0, 0, 0)),   # mask
                pl.BlockSpec((9, Cin, Cout), lambda n: (0, 0, 0)),    # resident weights
                pl.BlockSpec((1, Cin), lambda n: (0, 0)),
                pl.BlockSpec((1, Cin), lambda n: (0, 0)),
                pl.BlockSpec((1, Cout), lambda n: (0, 0)),
                pl.BlockSpec((1, Cout), lambda n: (0, 0)),
            ],
            out_specs=pl.BlockSpec((1, Ho + 2, Wo + 2, Cout), lambda n: (n, 0, 0, 0))),
        compiler_params=_compiler_params(),
    )(x_ph, mask, w_pk, s1.reshape(1, Cin), t1.reshape(1, Cin),
      s2.reshape(1, Cout), t2.reshape(1, Cout))


def conv2_residual(h_pad, w, residual):
    """conv2 (3x3, stride 1) on the padded bf16 intermediate + fused residual add.
    Returns exact (N, Ho, Wo, Cout) f32."""
    N, Hp, Wp, C = h_pad.shape
    Ho, Wo = Hp - 2, Wp - 2
    Cout = w.shape[-1]
    w_pk = w.reshape(9, C, Cout).astype(jnp.bfloat16)
    r = residual.astype(jnp.bfloat16)            # halves the residual HBM read

    kernel = functools.partial(_conv2_kernel, Ho=Ho, Wo=Wo)
    return pl.pallas_call(
        kernel,
        out_shape=jax.ShapeDtypeStruct((N, Ho, Wo, Cout), jnp.float32),
        grid_spec=pltpu.PrefetchScalarGridSpec(
            num_scalar_prefetch=0,
            grid=(N,),
            in_specs=[
                pl.BlockSpec((1, Hp, Wp, C), lambda n: (n, 0, 0, 0)),
                pl.BlockSpec((9, C, Cout), lambda n: (0, 0, 0)),      # resident weights
                pl.BlockSpec((1, Ho, Wo, Cout), lambda n: (n, 0, 0, 0)),
            ],
            out_specs=pl.BlockSpec((1, Ho, Wo, Cout), lambda n: (n, 0, 0, 0))),
        compiler_params=_compiler_params(),
    )(h_pad, w_pk, r)


# ----------------------------------------------------------------------------
# WideBasic block (mod=True): avg-pool + zero-channel-pad shortcut
# ----------------------------------------------------------------------------
def shortcut_mod(x, stride, out_c):
    # TODO(synk): reshape-based avg-pool assumes H, W divisible by stride.
    N, H, W, Cin = x.shape
    if stride != 1:
        x = x.reshape(N, H // stride, stride, W // stride, stride, Cin).mean(axis=(2, 4))
    if out_c > Cin:
        x = jnp.pad(x, ((0, 0), (0, 0), (0, 0), (0, out_c - Cin)))
    return x


def wide_basic_forward(params, x_nchw):
    """Eval-mode WideBasic(mod=True) forward. x: (N,Cin,H,W) f32 -> (N,Cout,Ho,Wo) f32."""
    slope = 0.01                                  # F.leaky_relu default (mod=True)
    stride = params["stride"]
    out_c = params["conv1"].shape[-1]

    x = jnp.transpose(x_nchw, (0, 2, 3, 1)).astype(jnp.float32)   # NCHW -> NHWC

    # Kernel 1: bn1+act fused into conv1, bn2+act epilogue, pre-padded bf16 output.
    h_pad = conv1_bn_act(x, params["conv1"], params["bn1"], params["bn2"], stride, slope)
    # TODO(synk): nn.Dropout(dropout_rate) is identity in eval mode; training-mode
    # RNG dropout (between bn2-act and conv2) is not implemented.

    # Kernel 2: conv2 with the shortcut residual add fused into its epilogue.
    sc = shortcut_mod(x, stride, out_c)
    out = conv2_residual(h_pad, params["conv2"], sc)

    return jnp.transpose(out, (0, 3, 1, 2))       # NHWC -> NCHW


# ----------------------------------------------------------------------------
# Deterministic synthetic parameters + pure-JAX f32 reference
# ----------------------------------------------------------------------------
def init_params(key, in_c, out_c, stride):
    gain = math.sqrt(2.0 / (1.0 + 0.01 ** 2))     # kaiming gain for leaky_relu(0.01)
    keys = iter(jax.random.split(key, 16))

    def conv_w(cin, cout):
        std = gain / math.sqrt(cout * 9)          # fan_out mode
        return jax.random.normal(next(keys), (3, 3, cin, cout), jnp.float32) * std

    def bn(c):
        return dict(
            gamma=1.0 + 0.1 * jax.random.normal(next(keys), (c,), jnp.float32),
            beta=0.1 * jax.random.normal(next(keys), (c,), jnp.float32),
            mean=0.1 * jax.random.normal(next(keys), (c,), jnp.float32),
            var=1.0 + 0.1 * jax.random.uniform(next(keys), (c,), jnp.float32))

    # TODO(synk): spectral_norm wrapped_conv and the mod=False variant
    # (1x1-conv shortcut, plain ReLU) are not implemented (spectral_norm off, mod=True).
    return dict(stride=stride,
                bn1=bn(in_c), conv1=conv_w(in_c, out_c),
                bn2=bn(out_c), conv2=conv_w(out_c, out_c))


def _reference_forward(params, x_nchw, eps=1e-5):
    """Pure-JAX f32 reference (lax.conv) mirroring the PyTorch eval forward."""
    slope = 0.01
    x = jnp.transpose(x_nchw, (0, 2, 3, 1)).astype(jnp.float32)

    def bn(v, p):
        s = p["gamma"] / jnp.sqrt(p["var"] + eps)
        return v * s + (p["beta"] - p["mean"] * s)

    def act(v):
        return jnp.where(v >= 0, v, slope * v)

    def conv(v, w, stride):
        return jax.lax.conv_general_dilated(
            v, w, (stride, stride), ((1, 1), (1, 1)),
            dimension_numbers=("NHWC", "HWIO", "NHWC"))

    out_c = params["conv1"].shape[-1]
    out = conv(act(bn(x, params["bn1"])), params["conv1"], params["stride"])
    out = conv(act(bn(out, params["bn2"])), params["conv2"], 1)
    out = out + shortcut_mod(x, params["stride"], out_c)
    return jnp.transpose(out, (0, 3, 1, 2))


if __name__ == "__main__":
    key = jax.random.PRNGKey(0)
    pkey, xkey = jax.random.split(key)

    batch, in_c, out_c, stride, hw = 2, 16, 32, 2, 16
    params = init_params(pkey, in_c, out_c, stride)
    x = jax.random.normal(xkey, (batch, in_c, hw, hw), jnp.float32)   # NCHW

    fwd = jax.jit(lambda inp: wide_basic_forward(params, inp))
    out = fwd(x)
    jax.block_until_ready(out)

    assert out.shape == (batch, out_c, hw // stride, hw // stride), out.shape
    assert out.dtype == jnp.float32

    # Correctness vs f32 lax.conv reference (bf16 MXU operands -> loose tolerance).
    ref = _reference_forward(params, x)
    rel_err = float(jnp.max(jnp.abs(out - ref)) / (jnp.max(jnp.abs(ref)) + 1e-6))
    assert rel_err < 5e-2, f"mismatch vs f32 reference: rel_err={rel_err}"

    print("KERNEL_OK")
</pallas_src>

<mosaic_0001>
module attributes {stable_mosaic.version = 11 : i64} {
  func.func @_conv1_kernel(%arg0: i32, %arg1: memref<1x4x9x9x16xf32, #tpu.memory_space<vmem>>, %arg2: memref<1x4x9x9x1xf32, #tpu.memory_space<vmem>>, %arg3: memref<9x16x32xbf16, #tpu.memory_space<vmem>>, %arg4: memref<1x16xf32, #tpu.memory_space<vmem>>, %arg5: memref<1x16xf32, #tpu.memory_space<vmem>>, %arg6: memref<1x32xf32, #tpu.memory_space<vmem>>, %arg7: memref<1x32xf32, #tpu.memory_space<vmem>>, %arg8: memref<1x10x10x32xbf16, #tpu.memory_space<vmem>>) attributes {dimension_semantics = [#tpu.dimension_semantics<parallel>], iteration_bounds = array<i64: 2>, scalar_prefetch = 0 : i64, scratch_operands = 0 : i64, tpu.core_type = #tpu.core_type<tc>, window_params = [{transform_indices = @transform_0, window_bounds = array<i64: 1, 4, 9, 9, 16>}, {pipeline_mode = #tpu.pipeline_mode<synchronous>, transform_indices = @transform_1, window_bounds = array<i64: 1, 4, 9, 9, 1>}, {pipeline_mode = #tpu.pipeline_mode<synchronous>, transform_indices = @transform_2, window_bounds = array<i64: 9, 16, 32>}, {pipeline_mode = #tpu.pipeline_mode<synchronous>, transform_indices = @transform_3, window_bounds = array<i64: 1, 16>}, {pipeline_mode = #tpu.pipeline_mode<synchronous>, transform_indices = @transform_4, window_bounds = array<i64: 1, 16>}, {pipeline_mode = #tpu.pipeline_mode<synchronous>, transform_indices = @transform_5, window_bounds = array<i64: 1, 32>}, {pipeline_mode = #tpu.pipeline_mode<synchronous>, transform_indices = @transform_6, window_bounds = array<i64: 1, 32>}, {transform_indices = @transform_7, window_bounds = array<i64: 1, 10, 10, 32>}]} {
    %c0 = arith.constant 0 : index
    %c0_0 = arith.constant 0 : index
    %c0_1 = arith.constant 0 : index
    %c0_2 = arith.constant 0 : index
    %c0_3 = arith.constant 0 : index
    %0 = vector.load %arg1[%c0, %c0_0, %c0_1, %c0_2, %c0_3] : memref<1x4x9x9x16xf32, #tpu.memory_space<vmem>>, vector<1x4x9x9x16xf32>
    %1 = vector.shape_cast %0 : vector<1x4x9x9x16xf32> to vector<4x9x9x16xf32>
    %c0_4 = arith.constant 0 : index
    %c0_5 = arith.constant 0 : index
    %2 = vector.load %arg4[%c0_4, %c0_5] : memref<1x16xf32, #tpu.memory_space<vmem>>, vector<1x16xf32>
    %3 = vector.shape_cast %2 : vector<1x16xf32> to vector<16xf32>
    %4 = vector.shape_cast %3 : vector<16xf32> to vector<1x1x1x16xf32>
    %5 = vector.broadcast %4 : vector<1x1x1x16xf32> to vector<4x9x9x16xf32>
    %6 = arith.mulf %1, %5 : vector<4x9x9x16xf32>
    %c0_6 = arith.constant 0 : index
    %c0_7 = arith.constant 0 : index
    %7 = vector.load %arg5[%c0_6, %c0_7] : memref<1x16xf32, #tpu.memory_space<vmem>>, vector<1x16xf32>
    %8 = vector.shape_cast %7 : vector<1x16xf32> to vector<16xf32>
    %9 = vector.shape_cast %8 : vector<16xf32> to vector<1x1x1x16xf32>
    %10 = vector.broadcast %9 : vector<1x1x1x16xf32> to vector<4x9x9x16xf32>
    %11 = arith.addf %6, %10 : vector<4x9x9x16xf32>
    %cst = arith.constant 0.000000e+00 : f32
    %12 = vector.broadcast %cst : f32 to vector<4x9x9x16xf32>
    %13 = arith.cmpf oge, %11, %12 : vector<4x9x9x16xf32>
    %cst_8 = arith.constant 0.00999999977 : f32
    %14 = vector.broadcast %cst_8 : f32 to vector<4x9x9x16xf32>
    %15 = arith.mulf %14, %11 : vector<4x9x9x16xf32>
    %16 = arith.select %13, %11, %15 : vector<4x9x9x16xi1>, vector<4x9x9x16xf32>
    %c0_9 = arith.constant 0 : index
    %c0_10 = arith.constant 0 : index
    %c0_11 = arith.constant 0 : index
    %c0_12 = arith.constant 0 : index
    %c0_13 = arith.constant 0 : index
    %17 = vector.load %arg2[%c0_9, %c0_10, %c0_11, %c0_12, %c0_13] : memref<1x4x9x9x1xf32, #tpu.memory_space<vmem>>, vector<1x4x9x9x1xf32>
    %18 = vector.shape_cast %17 : vector<1x4x9x9x1xf32> to vector<4x9x9x1xf32>
    %19 = vector.broadcast %18 : vector<4x9x9x1xf32> to vector<4x9x9x16xf32>
    %20 = arith.mulf %16, %19 : vector<4x9x9x16xf32>
    %21 = arith.truncf %20 : vector<4x9x9x16xf32> to vector<4x9x9x16xbf16>
    %cst_14 = arith.constant 0.000000e+00 : f32
    %22 = vector.broadcast %cst_14 : f32 to vector<64x32xf32>
    %23 = vector.extract_strided_slice %21 {offsets = [0, 0, 0, 0], sizes = [1, 8, 8, 16], strides = [1, 1, 1, 1]} : vector<4x9x9x16xbf16> to vector<1x8x8x16xbf16>
    %24 = vector.shape_cast %23 : vector<1x8x8x16xbf16> to vector<8x8x16xbf16>
    %25 = vector.shape_cast %24 : vector<8x8x16xbf16> to vector<64x16xbf16>
    %c0_15 = arith.constant 0 : index
    %c0_16 = arith.constant 0 : index
    %c0_17 = arith.constant 0 : index
    %26 = vector.load %arg3[%c0_15, %c0_16, %c0_17] : memref<9x16x32xbf16, #tpu.memory_space<vmem>>, vector<1x16x32xbf16>
    %27 = vector.shape_cast %26 : vector<1x16x32xbf16> to vector<16x32xbf16>
    %cst_18 = arith.constant dense<0.000000e+00> : vector<64x32xf32>
    %28 = tpu.matmul %25, %27, %cst_18 {dimension_numbers = #tpu.dot_dimension_numbers<[1], [0], [0], [1], [0, 0, 1, 1], [], []>} : vector<64x16xbf16>, vector<16x32xbf16>, vector<64x32xf32> -> vector<64x32xf32>
    %29 = arith.addf %22, %28 : vector<64x32xf32>
    %30 = vector.extract_strided_slice %21 {offsets = [1, 0, 0, 0], sizes = [1, 8, 8, 16], strides = [1, 1, 1, 1]} : vector<4x9x9x16xbf16> to vector<1x8x8x16xbf16>
    %31 = vector.shape_cast %30 : vector<1x8x8x16xbf16> to vector<8x8x16xbf16>
    %32 = vector.shape_cast %31 : vector<8x8x16xbf16> to vector<64x16xbf16>
    %c1 = arith.constant 1 : index
    %c0_19 = arith.constant 0 : index
    %c0_20 = arith.constant 0 : index
    %33 = vector.load %arg3[%c1, %c0_19, %c0_20] : memref<9x16x32xbf16, #tpu.memory_space<vmem>>, vector<1x16x32xbf16>
    %34 = vector.shape_cast %33 : vector<1x16x32xbf16> to vector<16x32xbf16>
    %cst_21 = arith.constant dense<0.000000e+00> : vector<64x32xf32>
    %35 = tpu.matmul %32, %34, %cst_21 {dimension_numbers = #tpu.dot_dimension_numbers<[1], [0], [0], [1], [0, 0, 1, 1], [], []>} : vector<64x16xbf16>, vector<16x32xbf16>, vector<64x32xf32> -> vector<64x32xf32>
    %36 = arith.addf %29, %35 : vector<64x32xf32>
    %37 = vector.extract_strided_slice %21 {offsets = [0, 0, 1, 0], sizes = [1, 8, 8, 16], strides = [1, 1, 1, 1]} : vector<4x9x9x16xbf16> to vector<1x8x8x16xbf16>
    %38 = vector.shape_cast %37 : vector<1x8x8x16xbf16> to vector<8x8x16xbf16>
    %39 = vector.shape_cast %38 : vector<8x8x16xbf16> to vector<64x16xbf16>
    %c2 = arith.constant 2 : index
    %c0_22 = arith.constant 0 : index
    %c0_23 = arith.constant 0 : index
    %40 = vector.load %arg3[%c2, %c0_22, %c0_23] : memref<9x16x32xbf16, #tpu.memory_space<vmem>>, vector<1x16x32xbf16>
    %41 = vector.shape_cast %40 : vector<1x16x32xbf16> to vector<16x32xbf16>
    %cst_24 = arith.constant dense<0.000000e+00> : vector<64x32xf32>
    %42 = tpu.matmul %39, %41, %cst_24 {dimension_numbers = #tpu.dot_dimension_numbers<[1], [0], [0], [1], [0, 0, 1, 1], [], []>} : vector<64x16xbf16>, vector<16x32xbf16>, vector<64x32xf32> -> vector<64x32xf32>
    %43 = arith.addf %36, %42 : vector<64x32xf32>
    %44 = vector.extract_strided_slice %21 {offsets = [2, 0, 0, 0], sizes = [1, 8, 8, 16], strides = [1, 1, 1, 1]} : vector<4x9x9x16xbf16> to vector<1x8x8x16xbf16>
    %45 = vector.shape_cast %44 : vector<1x8x8x16xbf16> to vector<8x8x16xbf16>
    %46 = vector.shape_cast %45 : vector<8x8x16xbf16> to vector<64x16xbf16>
    %c3 = arith.constant 3 : index
    %c0_25 = arith.constant 0 : index
    %c0_26 = arith.constant 0 : index
    %47 = vector.load %arg3[%c3, %c0_25, %c0_26] : memref<9x16x32xbf16, #tpu.memory_space<vmem>>, vector<1x16x32xbf16>
    %48 = vector.shape_cast %47 : vector<1x16x32xbf16> to vector<16x32xbf16>
    %cst_27 = arith.constant dense<0.000000e+00> : vector<64x32xf32>
    %49 = tpu.matmul %46, %48, %cst_27 {dimension_numbers = #tpu.dot_dimension_numbers<[1], [0], [0], [1], [0, 0, 1, 1], [], []>} : vector<64x16xbf16>, vector<16x32xbf16>, vector<64x32xf32> -> vector<64x32xf32>
    %50 = arith.addf %43, %49 : vector<64x32xf32>
    %51 = vector.extract_strided_slice %21 {offsets = [3, 0, 0, 0], sizes = [1, 8, 8, 16], strides = [1, 1, 1, 1]} : vector<4x9x9x16xbf16> to vector<1x8x8x16xbf16>
    %52 = vector.shape_cast %51 : vector<1x8x8x16xbf16> to vector<8x8x16xbf16>
    %53 = vector.shape_cast %52 : vector<8x8x16xbf16> to vector<64x16xbf16>
    %c4 = arith.constant 4 : index
    %c0_28 = arith.constant 0 : index
    %c0_29 = arith.constant 0 : index
    %54 = vector.load %arg3[%c4, %c0_28, %c0_29] : memref<9x16x32xbf16, #tpu.memory_space<vmem>>, vector<1x16x32xbf16>
    %55 = vector.shape_cast %54 : vector<1x16x32xbf16> to vector<16x32xbf16>
    %cst_30 = arith.constant dense<0.000000e+00> : vector<64x32xf32>
    %56 = tpu.matmul %53, %55, %cst_30 {dimension_numbers = #tpu.dot_dimension_numbers<[1], [0], [0], [1], [0, 0, 1, 1], [], []>} : vector<64x16xbf16>, vector<16x32xbf16>, vector<64x32xf32> -> vector<64x32xf32>
    %57 = arith.addf %50, %56 : vector<64x32xf32>
    %58 = vector.extract_strided_slice %21 {offsets = [2, 0, 1, 0], sizes = [1, 8, 8, 16], strides = [1, 1, 1, 1]} : vector<4x9x9x16xbf16> to vector<1x8x8x16xbf16>
    %59 = vector.shape_cast %58 : vector<1x8x8x16xbf16> to vector<8x8x16xbf16>
    %60 = vector.shape_cast %59 : vector<8x8x16xbf16> to vector<64x16xbf16>
    %c5 = arith.constant 5 : index
    %c0_31 = arith.constant 0 : index
    %c0_32 = arith.constant 0 : index
    %61 = vector.load %arg3[%c5, %c0_31, %c0_32] : memref<9x16x32xbf16, #tpu.memory_space<vmem>>, vector<1x16x32xbf16>
    %62 = vector.shape_cast %61 : vector<1x16x32xbf16> to vector<16x32xbf16>
    %cst_33 = arith.constant dense<0.000000e+00> : vector<64x32xf32>
    %63 = tpu.matmul %60, %62, %cst_33 {dimension_numbers = #tpu.dot_dimension_numbers<[1], [0], [0], [1], [0, 0, 1, 1], [], []>} : vector<64x16xbf16>, vector<16x32xbf16>, vector<64x32xf32> -> vector<64x32xf32>
    %64 = arith.addf %57, %63 : vector<64x32xf32>
    %65 = vector.extract_strided_slice %21 {offsets = [0, 1, 0, 0], sizes = [1, 8, 8, 16], strides = [1, 1, 1, 1]} : vector<4x9x9x16xbf16> to vector<1x8x8x16xbf16>
    %66 = vector.shape_cast %65 : vector<1x8x8x16xbf16> to vector<8x8x16xbf16>
    %67 = vector.shape_cast %66 : vector<8x8x16xbf16> to vector<64x16xbf16>
    %c6 = arith.constant 6 : index
    %c0_34 = arith.constant 0 : index
    %c0_35 = arith.constant 0 : index
    %68 = vector.load %arg3[%c6, %c0_34, %c0_35] : memref<9x16x32xbf16, #tpu.memory_space<vmem>>, vector<1x16x32xbf16>
    %69 = vector.shape_cast %68 : vector<1x16x32xbf16> to vector<16x32xbf16>
    %cst_36 = arith.constant dense<0.000000e+00> : vector<64x32xf32>
    %70 = tpu.matmul %67, %69, %cst_36 {dimension_numbers = #tpu.dot_dimension_numbers<[1], [0], [0], [1], [0, 0, 1, 1], [], []>} : vector<64x16xbf16>, vector<16x32xbf16>, vector<64x32xf32> -> vector<64x32xf32>
    %71 = arith.addf %64, %70 : vector<64x32xf32>
    %72 = vector.extract_strided_slice %21 {offsets = [1, 1, 0, 0], sizes = [1, 8, 8, 16], strides = [1, 1, 1, 1]} : vector<4x9x9x16xbf16> to vector<1x8x8x16xbf16>
    %73 = vector.shape_cast %72 : vector<1x8x8x16xbf16> to vector<8x8x16xbf16>
    %74 = vector.shape_cast %73 : vector<8x8x16xbf16> to vector<64x16xbf16>
    %c7 = arith.constant 7 : index
    %c0_37 = arith.constant 0 : index
    %c0_38 = arith.constant 0 : index
    %75 = vector.load %arg3[%c7, %c0_37, %c0_38] : memref<9x16x32xbf16, #tpu.memory_space<vmem>>, vector<1x16x32xbf16>
    %76 = vector.shape_cast %75 : vector<1x16x32xbf16> to vector<16x32xbf16>
    %cst_39 = arith.constant dense<0.000000e+00> : vector<64x32xf32>
    %77 = tpu.matmul %74, %76, %cst_39 {dimension_numbers = #tpu.dot_dimension_numbers<[1], [0], [0], [1], [0, 0, 1, 1], [], []>} : vector<64x16xbf16>, vector<16x32xbf16>, vector<64x32xf32> -> vector<64x32xf32>
    %78 = arith.addf %71, %77 : vector<64x32xf32>
    %79 = vector.extract_strided_slice %21 {offsets = [0, 1, 1, 0], sizes = [1, 8, 8, 16], strides = [1, 1, 1, 1]} : vector<4x9x9x16xbf16> to vector<1x8x8x16xbf16>
    %80 = vector.shape_cast %79 : vector<1x8x8x16xbf16> to vector<8x8x16xbf16>
    %81 = vector.shape_cast %80 : vector<8x8x16xbf16> to vector<64x16xbf16>
    %c8 = arith.constant 8 : index
    %c0_40 = arith.constant 0 : index
    %c0_41 = arith.constant 0 : index
    %82 = vector.load %arg3[%c8, %c0_40, %c0_41] : memref<9x16x32xbf16, #tpu.memory_space<vmem>>, vector<1x16x32xbf16>
    %83 = vector.shape_cast %82 : vector<1x16x32xbf16> to vector<16x32xbf16>
    %cst_42 = arith.constant dense<0.000000e+00> : vector<64x32xf32>
    %84 = tpu.matmul %81, %83, %cst_42 {dimension_numbers = #tpu.dot_dimension_numbers<[1], [0], [0], [1], [0, 0, 1, 1], [], []>} : vector<64x16xbf16>, vector<16x32xbf16>, vector<64x32xf32> -> vector<64x32xf32>
    %85 = arith.addf %78, %84 : vector<64x32xf32>
    %c0_43 = arith.constant 0 : index
    %c0_44 = arith.constant 0 : index
    %86 = vector.load %arg6[%c0_43, %c0_44] : memref<1x32xf32, #tpu.memory_space<vmem>>, vector<1x32xf32>
    %87 = vector.broadcast %86 : vector<1x32xf32> to vector<64x32xf32>
    %88 = arith.mulf %85, %87 : vector<64x32xf32>
    %c0_45 = arith.constant 0 : index
    %c0_46 = arith.constant 0 : index
    %89 = vector.load %arg7[%c0_45, %c0_46] : memref<1x32xf32, #tpu.memory_space<vmem>>, vector<1x32xf32>
    %90 = vector.broadcast %89 : vector<1x32xf32> to vector<64x32xf32>
    %91 = arith.addf %88, %90 : vector<64x32xf32>
    %cst_47 = arith.constant 0.000000e+00 : f32
    %92 = vector.broadcast %cst_47 : f32 to vector<64x32xf32>
    %93 = arith.cmpf oge, %91, %92 : vector<64x32xf32>
    %cst_48 = arith.constant 0.00999999977 : f32
    %94 = vector.broadcast %cst_48 : f32 to vector<64x32xf32>
    %95 = arith.mulf %94, %91 : vector<64x32xf32>
    %96 = arith.select %93, %91, %95 : vector<64x32xi1>, vector<64x32xf32>
    %cst_49 = arith.constant 0.000000e+00 : bf16
    %97 = vector.broadcast %cst_49 : bf16 to vector<1x10x10x32xbf16>
    %c0_50 = arith.constant 0 : index
    %c0_51 = arith.constant 0 : index
    %c0_52 = arith.constant 0 : index
    %c0_53 = arith.constant 0 : index
    %98 = vector.load %arg8[%c0_50, %c0_51, %c0_52, %c0_53] : memref<1x10x10x32xbf16, #tpu.memory_space<vmem>>, vector<1x10x10x32xbf16>
    tpu.vector_store %arg8[%c0_50, %c0_51, %c0_52, %c0_53], %97 {strides = array<i32>} : memref<1x10x10x32xbf16, #tpu.memory_space<vmem>>, vector<1x10x10x32xbf16>,
    %99 = vector.shape_cast %96 : vector<64x32xf32> to vector<8x8x32xf32>
    %100 = arith.truncf %99 : vector<8x8x32xf32> to vector<8x8x32xbf16>
    %c0_54 = arith.constant 0 : index
    %c1_55 = arith.constant 1 : index
    %c1_56 = arith.constant 1 : index
    %c0_57 = arith.constant 0 : index
    %101 = vector.load %arg8[%c0_54, %c1_55, %c1_56, %c0_57] : memref<1x10x10x32xbf16, #tpu.memory_space<vmem>>, vector<1x8x8x32xbf16>
    %102 = vector.shape_cast %101 : vector<1x8x8x32xbf16> to vector<8x8x32xbf16>
    %103 = vector.shape_cast %100 : vector<8x8x32xbf16> to vector<1x8x8x32xbf16>
    tpu.vector_store %arg8[%c0_54, %c1_55, %c1_56, %c0_57], %103 {strides = array<i32>} : memref<1x10x10x32xbf16, #tpu.memory_space<vmem>>, vector<1x8x8x32xbf16>,
    return
  }
  func.func @transform_0(%arg0: i32) -> (i32, i32, i32, i32, i32) {
    %c0_i32 = arith.constant 0 : i32
    %c0_i32_0 = arith.constant 0 : i32
    %c0_i32_1 = arith.constant 0 : i32
    %c0_i32_2 = arith.constant 0 : i32
    %c0_i32_3 = arith.constant 0 : i32
    return %arg0, %c0_i32, %c0_i32_0, %c0_i32_1, %c0_i32_2 : i32, i32, i32, i32, i32
  }
  func.func @transform_1(%arg0: i32) -> (i32, i32, i32, i32, i32) {
    %c0_i32 = arith.constant 0 : i32
    %c0_i32_0 = arith.constant 0 : i32
    %c0_i32_1 = arith.constant 0 : i32
    %c0_i32_2 = arith.constant 0 : i32
    %c0_i32_3 = arith.constant 0 : i32
    %c0_i32_4 = arith.constant 0 : i32
    return %c0_i32, %c0_i32_0, %c0_i32_1, %c0_i32_2, %c0_i32_3 : i32, i32, i32, i32, i32
  }
  func.func @transform_2(%arg0: i32) -> (i32, i32, i32) {
    %c0_i32 = arith.constant 0 : i32
    %c0_i32_0 = arith.constant 0 : i32
    %c0_i32_1 = arith.constant 0 : i32
    %c0_i32_2 = arith.constant 0 : i32
    return %c0_i32, %c0_i32_0, %c0_i32_1 : i32, i32, i32
  }
  func.func @transform_3(%arg0: i32) -> (i32, i32) {
    %c0_i32 = arith.constant 0 : i32
    %c0_i32_0 = arith.constant 0 : i32
    %c0_i32_1 = arith.constant 0 : i32
    return %c0_i32, %c0_i32_0 : i32, i32
  }
  func.func @transform_4(%arg0: i32) -> (i32, i32) {
    %c0_i32 = arith.constant 0 : i32
    %c0_i32_0 = arith.constant 0 : i32
    %c0_i32_1 = arith.constant 0 : i32
    return %c0_i32, %c0_i32_0 : i32, i32
  }
  func.func @transform_5(%arg0: i32) -> (i32, i32) {
    %c0_i32 = arith.constant 0 : i32
    %c0_i32_0 = arith.constant 0 : i32
    %c0_i32_1 = arith.constant 0 : i32
    return %c0_i32, %c0_i32_0 : i32, i32
  }
  func.func @transform_6(%arg0: i32) -> (i32, i32) {
    %c0_i32 = arith.constant 0 : i32
    %c0_i32_0 = arith.constant 0 : i32
    %c0_i32_1 = arith.constant 0 : i32
    return %c0_i32, %c0_i32_0 : i32, i32
  }
  func.func @transform_7(%arg0: i32) -> (i32, i32, i32, i32) {
    %c0_i32 = arith.constant 0 : i32
    %c0_i32_0 = arith.constant 0 : i32
    %c0_i32_1 = arith.constant 0 : i32
    %c0_i32_2 = arith.constant 0 : i32
    return %arg0, %c0_i32, %c0_i32_0, %c0_i32_1 : i32, i32, i32, i32
  }
}

module attributes {stable_mosaic.version = 11 : i64} {
  func.func @_conv2_kernel(%arg0: i32, %arg1: memref<1x10x10x32xbf16, #tpu.memory_space<vmem>>, %arg2: memref<9x32x32xbf16, #tpu.memory_space<vmem>>, %arg3: memref<1x8x8x32xbf16, #tpu.memory_space<vmem>>, %arg4: memref<1x8x8x32xf32, #tpu.memory_space<vmem>>) attributes {dimension_semantics = [#tpu.dimension_semantics<parallel>], iteration_bounds = array<i64: 2>, scalar_prefetch = 0 : i64, scratch_operands = 0 : i64, tpu.core_type = #tpu.core_type<tc>, window_params = [{transform_indices = @transform_0, window_bounds = array<i64: 1, 10, 10, 32>}, {pipeline_mode = #tpu.pipeline_mode<synchronous>, transform_indices = @transform_1, window_bounds = array<i64: 9, 32, 32>}, {transform_indices = @transform_2, window_bounds = array<i64: 1, 8, 8, 32>}, {transform_indices = @transform_3, window_bounds = array<i64: 1, 8, 8, 32>}]} {
    %c0 = arith.constant 0 : index
    %c0_0 = arith.constant 0 : index
    %c0_1 = arith.constant 0 : index
    %c0_2 = arith.constant 0 : index
    %0 = vector.load %arg1[%c0, %c0_0, %c0_1, %c0_2] : memref<1x10x10x32xbf16, #tpu.memory_space<vmem>>, vector<1x10x10x32xbf16>
    %cst = arith.constant 0.000000e+00 : f32
    %1 = vector.broadcast %cst : f32 to vector<64x32xf32>
    %2 = vector.extract_strided_slice %0 {offsets = [0, 0, 0, 0], sizes = [1, 8, 8, 32], strides = [1, 1, 1, 1]} : vector<1x10x10x32xbf16> to vector<1x8x8x32xbf16>
    %3 = vector.shape_cast %2 : vector<1x8x8x32xbf16> to vector<8x8x32xbf16>
    %4 = vector.shape_cast %3 : vector<8x8x32xbf16> to vector<64x32xbf16>
    %c0_3 = arith.constant 0 : index
    %c0_4 = arith.constant 0 : index
    %c0_5 = arith.constant 0 : index
    %5 = vector.load %arg2[%c0_3, %c0_4, %c0_5] : memref<9x32x32xbf16, #tpu.memory_space<vmem>>, vector<1x32x32xbf16>
    %6 = vector.shape_cast %5 : vector<1x32x32xbf16> to vector<32x32xbf16>
    %cst_6 = arith.constant dense<0.000000e+00> : vector<64x32xf32>
    %7 = tpu.matmul %4, %6, %cst_6 {dimension_numbers = #tpu.dot_dimension_numbers<[1], [0], [0], [1], [0, 0, 1, 1], [], []>} : vector<64x32xbf16>, vector<32x32xbf16>, vector<64x32xf32> -> vector<64x32xf32>
    %8 = arith.addf %1, %7 : vector<64x32xf32>
    %9 = vector.extract_strided_slice %0 {offsets = [0, 0, 1, 0], sizes = [1, 8, 8, 32], strides = [1, 1, 1, 1]} : vector<1x10x10x32xbf16> to vector<1x8x8x32xbf16>
    %10 = vector.shape_cast %9 : vector<1x8x8x32xbf16> to vector<8x8x32xbf16>
    %11 = vector.shape_cast %10 : vector<8x8x32xbf16> to vector<64x32xbf16>
    %c1 = arith.constant 1 : index
    %c0_7 = arith.constant 0 : index
    %c0_8 = arith.constant 0 : index
    %12 = vector.load %arg2[%c1, %c0_7, %c0_8] : memref<9x32x32xbf16, #tpu.memory_space<vmem>>, vector<1x32x32xbf16>
    %13 = vector.shape_cast %12 : vector<1x32x32xbf16> to vector<32x32xbf16>
    %cst_9 = arith.constant dense<0.000000e+00> : vector<64x32xf32>
    %14 = tpu.matmul %11, %13, %cst_9 {dimension_numbers = #tpu.dot_dimension_numbers<[1], [0], [0], [1], [0, 0, 1, 1], [], []>} : vector<64x32xbf16>, vector<32x32xbf16>, vector<64x32xf32> -> vector<64x32xf32>
    %15 = arith.addf %8, %14 : vector<64x32xf32>
    %16 = vector.extract_strided_slice %0 {offsets = [0, 0, 2, 0], sizes = [1, 8, 8, 32], strides = [1, 1, 1, 1]} : vector<1x10x10x32xbf16> to vector<1x8x8x32xbf16>
    %17 = vector.shape_cast %16 : vector<1x8x8x32xbf16> to vector<8x8x32xbf16>
    %18 = vector.shape_cast %17 : vector<8x8x32xbf16> to vector<64x32xbf16>
    %c2 = arith.constant 2 : index
    %c0_10 = arith.constant 0 : index
    %c0_11 = arith.constant 0 : index
    %19 = vector.load %arg2[%c2, %c0_10, %c0_11] : memref<9x32x32xbf16, #tpu.memory_space<vmem>>, vector<1x32x32xbf16>
    %20 = vector.shape_cast %19 : vector<1x32x32xbf16> to vector<32x32xbf16>
    %cst_12 = arith.constant dense<0.000000e+00> : vector<64x32xf32>
    %21 = tpu.matmul %18, %20, %cst_12 {dimension_numbers = #tpu.dot_dimension_numbers<[1], [0], [0], [1], [0, 0, 1, 1], [], []>} : vector<64x32xbf16>, vector<32x32xbf16>, vector<64x32xf32> -> vector<64x32xf32>
    %22 = arith.addf %15, %21 : vector<64x32xf32>
    %23 = vector.extract_strided_slice %0 {offsets = [0, 1, 0, 0], sizes = [1, 8, 8, 32], strides = [1, 1, 1, 1]} : vector<1x10x10x32xbf16> to vector<1x8x8x32xbf16>
    %24 = vector.shape_cast %23 : vector<1x8x8x32xbf16> to vector<8x8x32xbf16>
    %25 = vector.shape_cast %24 : vector<8x8x32xbf16> to vector<64x32xbf16>
    %c3 = arith.constant 3 : index
    %c0_13 = arith.constant 0 : index
    %c0_14 = arith.constant 0 : index
    %26 = vector.load %arg2[%c3, %c0_13, %c0_14] : memref<9x32x32xbf16, #tpu.memory_space<vmem>>, vector<1x32x32xbf16>
    %27 = vector.shape_cast %26 : vector<1x32x32xbf16> to vector<32x32xbf16>
    %cst_15 = arith.constant dense<0.000000e+00> : vector<64x32xf32>
    %28 = tpu.matmul %25, %27, %cst_15 {dimension_numbers = #tpu.dot_dimension_numbers<[1], [0], [0], [1], [0, 0, 1, 1], [], []>} : vector<64x32xbf16>, vector<32x32xbf16>, vector<64x32xf32> -> vector<64x32xf32>
    %29 = arith.addf %22, %28 : vector<64x32xf32>
    %30 = vector.extract_strided_slice %0 {offsets = [0, 1, 1, 0], sizes = [1, 8, 8, 32], strides = [1, 1, 1, 1]} : vector<1x10x10x32xbf16> to vector<1x8x8x32xbf16>
    %31 = vector.shape_cast %30 : vector<1x8x8x32xbf16> to vector<8x8x32xbf16>
    %32 = vector.shape_cast %31 : vector<8x8x32xbf16> to vector<64x32xbf16>
    %c4 = arith.constant 4 : index
    %c0_16 = arith.constant 0 : index
    %c0_17 = arith.constant 0 : index
    %33 = vector.load %arg2[%c4, %c0_16, %c0_17] : memref<9x32x32xbf16, #tpu.memory_space<vmem>>, vector<1x32x32xbf16>
    %34 = vector.shape_cast %33 : vector<1x32x32xbf16> to vector<32x32xbf16>
    %cst_18 = arith.constant dense<0.000000e+00> : vector<64x32xf32>
    %35 = tpu.matmul %32, %34, %cst_18 {dimension_numbers = #tpu.dot_dimension_numbers<[1], [0], [0], [1], [0, 0, 1, 1], [], []>} : vector<64x32xbf16>, vector<32x32xbf16>, vector<64x32xf32> -> vector<64x32xf32>
    %36 = arith.addf %29, %35 : vector<64x32xf32>
    %37 = vector.extract_strided_slice %0 {offsets = [0, 1, 2, 0], sizes = [1, 8, 8, 32], strides = [1, 1, 1, 1]} : vector<1x10x10x32xbf16> to vector<1x8x8x32xbf16>
    %38 = vector.shape_cast %37 : vector<1x8x8x32xbf16> to vector<8x8x32xbf16>
    %39 = vector.shape_cast %38 : vector<8x8x32xbf16> to vector<64x32xbf16>
    %c5 = arith.constant 5 : index
    %c0_19 = arith.constant 0 : index
    %c0_20 = arith.constant 0 : index
    %40 = vector.load %arg2[%c5, %c0_19, %c0_20] : memref<9x32x32xbf16, #tpu.memory_space<vmem>>, vector<1x32x32xbf16>
    %41 = vector.shape_cast %40 : vector<1x32x32xbf16> to vector<32x32xbf16>
    %cst_21 = arith.constant dense<0.000000e+00> : vector<64x32xf32>
    %42 = tpu.matmul %39, %41, %cst_21 {dimension_numbers = #tpu.dot_dimension_numbers<[1], [0], [0], [1], [0, 0, 1, 1], [], []>} : vector<64x32xbf16>, vector<32x32xbf16>, vector<64x32xf32> -> vector<64x32xf32>
    %43 = arith.addf %36, %42 : vector<64x32xf32>
    %44 = vector.extract_strided_slice %0 {offsets = [0, 2, 0, 0], sizes = [1, 8, 8, 32], strides = [1, 1, 1, 1]} : vector<1x10x10x32xbf16> to vector<1x8x8x32xbf16>
    %45 = vector.shape_cast %44 : vector<1x8x8x32xbf16> to vector<8x8x32xbf16>
    %46 = vector.shape_cast %45 : vector<8x8x32xbf16> to vector<64x32xbf16>
    %c6 = arith.constant 6 : index
    %c0_22 = arith.constant 0 : index
    %c0_23 = arith.constant 0 : index
    %47 = vector.load %arg2[%c6, %c0_22, %c0_23] : memref<9x32x32xbf16, #tpu.memory_space<vmem>>, vector<1x32x32xbf16>
    %48 = vector.shape_cast %47 : vector<1x32x32xbf16> to vector<32x32xbf16>
    %cst_24 = arith.constant dense<0.000000e+00> : vector<64x32xf32>
    %49 = tpu.matmul %46, %48, %cst_24 {dimension_numbers = #tpu.dot_dimension_numbers<[1], [0], [0], [1], [0, 0, 1, 1], [], []>} : vector<64x32xbf16>, vector<32x32xbf16>, vector<64x32xf32> -> vector<64x32xf32>
    %50 = arith.addf %43, %49 : vector<64x32xf32>
    %51 = vector.extract_strided_slice %0 {offsets = [0, 2, 1, 0], sizes = [1, 8, 8, 32], strides = [1, 1, 1, 1]} : vector<1x10x10x32xbf16> to vector<1x8x8x32xbf16>
    %52 = vector.shape_cast %51 : vector<1x8x8x32xbf16> to vector<8x8x32xbf16>
    %53 = vector.shape_cast %52 : vector<8x8x32xbf16> to vector<64x32xbf16>
    %c7 = arith.constant 7 : index
    %c0_25 = arith.constant 0 : index
    %c0_26 = arith.constant 0 : index
    %54 = vector.load %arg2[%c7, %c0_25, %c0_26] : memref<9x32x32xbf16, #tpu.memory_space<vmem>>, vector<1x32x32xbf16>
    %55 = vector.shape_cast %54 : vector<1x32x32xbf16> to vector<32x32xbf16>
    %cst_27 = arith.constant dense<0.000000e+00> : vector<64x32xf32>
    %56 = tpu.matmul %53, %55, %cst_27 {dimension_numbers = #tpu.dot_dimension_numbers<[1], [0], [0], [1], [0, 0, 1, 1], [], []>} : vector<64x32xbf16>, vector<32x32xbf16>, vector<64x32xf32> -> vector<64x32xf32>
    %57 = arith.addf %50, %56 : vector<64x32xf32>
    %58 = vector.extract_strided_slice %0 {offsets = [0, 2, 2, 0], sizes = [1, 8, 8, 32], strides = [1, 1, 1, 1]} : vector<1x10x10x32xbf16> to vector<1x8x8x32xbf16>
    %59 = vector.shape_cast %58 : vector<1x8x8x32xbf16> to vector<8x8x32xbf16>
    %60 = vector.shape_cast %59 : vector<8x8x32xbf16> to vector<64x32xbf16>
    %c8 = arith.constant 8 : index
    %c0_28 = arith.constant 0 : index
    %c0_29 = arith.constant 0 : index
    %61 = vector.load %arg2[%c8, %c0_28, %c0_29] : memref<9x32x32xbf16, #tpu.memory_space<vmem>>, vector<1x32x32xbf16>
    %62 = vector.shape_cast %61 : vector<1x32x32xbf16> to vector<32x32xbf16>
    %cst_30 = arith.constant dense<0.000000e+00> : vector<64x32xf32>
    %63 = tpu.matmul %60, %62, %cst_30 {dimension_numbers = #tpu.dot_dimension_numbers<[1], [0], [0], [1], [0, 0, 1, 1], [], []>} : vector<64x32xbf16>, vector<32x32xbf16>, vector<64x32xf32> -> vector<64x32xf32>
    %64 = arith.addf %57, %63 : vector<64x32xf32>
    %c0_31 = arith.constant 0 : index
    %c0_32 = arith.constant 0 : index
    %c0_33 = arith.constant 0 : index
    %c0_34 = arith.constant 0 : index
    %65 = vector.load %arg3[%c0_31, %c0_32, %c0_33, %c0_34] : memref<1x8x8x32xbf16, #tpu.memory_space<vmem>>, vector<1x8x8x32xbf16>
    %66 = vector.shape_cast %65 : vector<1x8x8x32xbf16> to vector<8x8x32xbf16>
    %67 = arith.extf %66 : vector<8x8x32xbf16> to vector<8x8x32xf32>
    %68 = vector.shape_cast %67 : vector<8x8x32xf32> to vector<64x32xf32>
    %69 = arith.addf %64, %68 : vector<64x32xf32>
    %70 = vector.shape_cast %69 : vector<64x32xf32> to vector<8x8x32xf32>
    %c0_35 = arith.constant 0 : index
    %c0_36 = arith.constant 0 : index
    %c0_37 = arith.constant 0 : index
    %c0_38 = arith.constant 0 : index
    %71 = vector.load %arg4[%c0_35, %c0_36, %c0_37, %c0_38] : memref<1x8x8x32xf32, #tpu.memory_space<vmem>>, vector<1x8x8x32xf32>
    %72 = vector.shape_cast %71 : vector<1x8x8x32xf32> to vector<8x8x32xf32>
    %73 = vector.shape_cast %70 : vector<8x8x32xf32> to vector<1x8x8x32xf32>
    tpu.vector_store %arg4[%c0_35, %c0_36, %c0_37, %c0_38], %73 {strides = array<i32>} : memref<1x8x8x32xf32, #tpu.memory_space<vmem>>, vector<1x8x8x32xf32>,
    return
  }
  func.func @transform_0(%arg0: i32) -> (i32, i32, i32, i32) {
    %c0_i32 = arith.constant 0 : i32
    %c0_i32_0 = arith.constant 0 : i32
    %c0_i32_1 = arith.constant 0 : i32
    %c0_i32_2 = arith.constant 0 : i32
    return %arg0, %c0_i32, %c0_i32_0, %c0_i32_1 : i32, i32, i32, i32
  }
  func.func @transform_1(%arg0: i32) -> (i32, i32, i32) {
    %c0_i32 = arith.constant 0 : i32
    %c0_i32_0 = arith.constant 0 : i32
    %c0_i32_1 = arith.constant 0 : i32
    %c0_i32_2 = arith.constant 0 : i32
    return %c0_i32, %c0_i32_0, %c0_i32_1 : i32, i32, i32
  }
  func.func @transform_2(%arg0: i32) -> (i32, i32, i32, i32) {
    %c0_i32 = arith.constant 0 : i32
    %c0_i32_0 = arith.constant 0 : i32
    %c0_i32_1 = arith.constant 0 : i32
    %c0_i32_2 = arith.constant 0 : i32
    return %arg0, %c0_i32, %c0_i32_0, %c0_i32_1 : i32, i32, i32, i32
  }
  func.func @transform_3(%arg0: i32) -> (i32, i32, i32, i32) {
    %c0_i32 = arith.constant 0 : i32
    %c0_i32_0 = arith.constant 0 : i32
    %c0_i32_1 = arith.constant 0 : i32
    %c0_i32_2 = arith.constant 0 : i32
    return %arg0, %c0_i32, %c0_i32_0, %c0_i32_1 : i32, i32, i32, i32
  }
}

</mosaic_0001>

<bundles_post_ra>
// kernel: _lambda_.3
= control target key start
LH: loop header
LB: loop body
LE: loop exit
PB: predicated region body
PF: predicated region fallthrough
CT: control target
= control target key end

     0   :  { %8 = vsyncpa [#allocation3], 0  ;;  %s2479_s0 = inlined_call_operand.vmem [shape: bf16[2,10,10,32], index: 0, kind: input, shape index: {}]   ;;  %s2480_s1 = inlined_call_operand.vmem [shape: bf16[9,32,32], index: 1, kind: input, shape index: {}]   ;;  %s2481_s2 = inlined_call_operand.vmem [shape: bf16[2,8,8,32], index: 2, kind: input, shape index: {}]   ;;  %s2482_s3 = inlined_call_operand.hbm [shape: f32[2,8,8,32], index: 3, kind: output, shape index: {}]  }
   0x1   :  { %10 = vsyncpa [#allocation3 + $0x1], 0  ;;  %s2011_s12 = smov 0   ;;  %s2013_s13 = smov 0  }
   0x2   :  { %s2015_s14 = smov 0   ;;  %s2017_s15 = smov 0  }
   0x3 LB: > { %s2032_s16 = sadd.s32 4294967295, %s1986_s15   ;;  %s1468_s17 = sadd.s32 4294967294, %s1986_s15   ;;  %s1986_s15 = sphi %s2017_s15, %s2492_s15   ;;  %s1982_s14 = sphi %s2015_s14, %s2491_s14   ;;  %s1978_s13 = sphi %s2013_s13, %s2490_s13   ;;  %s1974_s12 = sphi %s2011_s12, %s2489_s12  }
   0x4   : > { %s2036_s18 = sadd.s32 1, %s1986_s15   ;;  %s96_s19 = sadd.s32 1, %s1982_s14 }
   0x5   : > { %s93_s20 = ssub.s32 %s1986_s15, %s2036_s18  ;;  %p106_p0 = scmp.ne.s32.totalorder %s1982_s14, %s1978_s13 }
   0x6   : > { %p94_p1 = scmp.eq.s32.totalorder %s93_s20, 0  ;;  %p107_p2 = scmp.eq.s32.totalorder %s2032_s16, 1 }
   0x7   : > { %p112_p3 = scmp.ne.s32.totalorder %s1978_s13, %s1974_s12  ;;  %p113_p4 = scmp.eq.s32.totalorder %s1468_s17, 1 }
   0x8   : > { %s2047_s21 = scalar_select %p94_p1, %s1982_s14, %s96_s19  }
   0x9   : > { %p2049_p5 = por %p107_p2, %p106_p0  ;;  %p2053_p6 = por %p113_p4, %p112_p3 }
   0xa   : > { %p1471_p7 = scmp.ge.s32.totalorder %s1986_s15, 1  ;;  %p150_p8 = scmp.lt.s32.totalorder %s1986_s15, 3 }
   0xc   : > { %p151_p9 = pnand %p1471_p7, %p150_p8 }
   0xd   : > { %v1897_v0 = vld [vmem:[%s2480_s1 + $0x10] sm:$0xff] (!%p151_p9)   ;;  %p179_p10 = scmp.lt.s32.totalorder (!%p151_p9), %s2032_s16, 1  ;;  %v2066_v1 = vld [vmem:[%s2480_s1 + $0x40] sm:$0xff] (!%p151_p9)   ;;  %v1899_v2 = vld [vmem:[%s2480_s1 + $0x18] sm:$0xff] (!%p151_p9)   ;;  %vm214_vm0 = vsmask.f32 (!%p151_p9), 3328 }
   0xe   : > { %154 = sbr.rel (%p151_p9) target bundleno = 349 (0x15d), region = 32  ;;  %1679 = vmatprep.subr.bf16.mxu1 (!%p151_p9), %v1897_v0  ;;  %1727 = vmatprep.subr.bf16.mxu0 (!%p151_p9), %v2066_v1  ;;  %v2078_v3 = vld [vmem:[%s2480_s1 + $0x48] sm:$0xff] (!%p151_p9)   ;;  %v2085_v4 = vld [vmem:[%s2480_s1] sm:$0xff] (!%p151_p9)   ;;  %vm215_vm1 = vsmask.f32 (!%p151_p9), 7440  ;;  %v2096_v5 = vld [vmem:[%s2480_s1 + $0x50] sm:$0xff] (!%p151_p9)  }
   0xf   : > { %1680 = vmatpush3.bf16.msra.mxu1 (!%p151_p9), %v1897_v0  ;;  %1728 = vmatpush3.bf16.msra.mxu0 (!%p151_p9), %v2066_v1  ;;  %vm358_vm2 = vcmask (!%p151_p9), 261120   ;;  %vm2142_vm3 = vmor (!%p151_p9), %vm214_vm0, %vm215_vm1  ;;  %vm553_vm4 = vcmask (!%p151_p9), 1042432   ;;  %vm554_vm5 = vcmask (!%p151_p9), 1046532   ;;  %s176_s8 = sand.u32 (!%p151_p9), 1, %s1978_s13   ;;  %s1605_s10 = sshll.u32 (!%p151_p9), %s2032_s16, 10 }
  0x10   : > { %1681 = vmatprep.subr.bf16.mxu1 (!%p151_p9), %v1899_v2  ;;  %1729 = vmatprep.subr.bf16.mxu0 (!%p151_p9), %v2078_v3  ;;  %vm2208_vm6 = vmor (!%p151_p9), %vm553_vm4, %vm554_vm5  ;;  %s1472_s9 = sshll.u32 (!%p151_p9), %s176_s8, 6  ;;  %s2426_s20 = scalar_lea.hbm (!%p151_p9), %s2482_s3, %s1605_s10 }
  0x11   : > { %s1988_s25 = smov (!%p151_p9), [#allocation2]  }
  0x12   : > { %s1928_s26 = sshll.u32 (!%p151_p9), %s1988_s25, 4  ;;  %s1929_s26 = int_to_ptr.vmem [resolvable:$false] %s1928_s26 }
  0x13   : > { %1682 = vmatpush3.bf16.msra.mxu1 (!%p151_p9), %v1899_v2  ;;  %1730 = vmatpush3.bf16.msra.mxu0 (!%p151_p9), %v2078_v3  ;;  %s1930_s27 = scalar_lea.vmem (!%p151_p9), %s1929_s26, 2048 }
  0x14   : > { %1691 = vmatprep.subr.bf16.mxu1 (!%p151_p9), %v2085_v4  ;;  %1739 = vmatprep.subr.bf16.mxu0 (!%p151_p9), %v2096_v5 }
  0x15   : > { %s2072_s30 = scalar_select %p179_p10, %s2032_s16, 1 }
  0x16   : > { %s2438_s16 = scalar_lea.sflag [#allocation3], %s176_s8 }
  0x17   : > { %s1855_s6 = smul.u32 80, %s2072_s30  ;;  %s1604_s4 = sshll.u32 %s2072_s30, 5 }
  0x18   : > { %s188_s7 = scalar_lea.vmem %s2481_s2, %s1604_s4  ;;  %s2409_s30 = scalar_lea.vmem [#allocation2], %s1472_s9 }
  0x19   : > { %s2091_s11 = scalar_lea.vmem %s2479_s0, %s1855_s6 }
  0x1a   : > { %v2099_v6 = vld [vmem:[%s2091_s11] sm:$0xf]  ;;  %v2102_v7 = vld [vmem:[%s2091_s11 + $0x4] sm:$0x1]  ;;  %v2105_v8 = vld [vmem:[%s2091_s11 + $0x8] sm:$0xf] }
  0x1b   : > { %v2109_v9 = vld [vmem:[%s2091_s11 + $0xc] sm:$0x1]  ;;  %v218_v10 = vshrl.u32 %v2099_v6, 16  ;;  %v221_v11 = vshll.u32 %v2099_v6, 16  ;;  %v227_v12 = vshll.u32 %v2102_v7, 16  ;;  %v232_v13 = vshrl.u32 %v2105_v8, 16 }
  0x1c   : > { %v235_v14 = vshll.u32 %v2105_v8, 16  ;;  %v241_v15 = vshll.u32 %v2109_v9, 16  ;;  %v562_v16 = vrot.slane %v2109_v9, 5  ;;  %v2120_v17 = vld [vmem:[%s2091_s11 + $0x10] sm:$0xf] }
  0x1d   : > { %v220_v18 = vrot.slane %v218_v10, 4  ;;  %v223_v19 = vrot.slane %v221_v11, 5  ;;  %v229_v20 = vrot.slane %v227_v12, 5  ;;  %v234_v21 = vrot.slane %v232_v13, 4  ;;  %v2124_v22 = vld [vmem:[%s2091_s11 + $0x14] sm:$0x1] }
  0x1e   : > { %v237_v23 = vrot.slane %v235_v14, 5  ;;  %v243_v24 = vrot.slane %v241_v15, 5  ;;  %v2127_v25 = vld [vmem:[%s2091_s11 + $0x18] sm:$0xf]  ;;  %v2130_v26 = vld [vmem:[%s2091_s11 + $0x1c] sm:$0x1] }
  0x1f   : > { %v224_v27 = vor.u32 %v223_v19, %v220_v18  ;;  %v2133_v28 = vld [vmem:[%s2091_s11 + $0x20] sm:$0xf]  ;;  %v2136_v29 = vld [vmem:[%s2091_s11 + $0x24] sm:$0x1]  ;;  %v246_v30 = vshrl.u32 %v2120_v17, 16  ;;  %v249_v31 = vshll.u32 %v2120_v17, 16 }
  0x20   : > { %v238_v33 = vor.u32 %v237_v23, %v234_v21  ;;  %v255_v34 = vshll.u32 %v2124_v22, 16  ;;  %v260_v35 = vshrl.u32 %v2127_v25, 16  ;;  %v263_v36 = vshll.u32 %v2127_v25, 16  ;;  %v2154_v49 = vld [vmem:[%s2091_s11 + $0x28] sm:$0xf] }
  0x21   : > { %v225_v37 = vrot.slane %v224_v27, 4  ;;  %v248_v38 = vrot.slane %v246_v30, 4  ;;  %v251_v39 = vrot.slane %v249_v31, 5  ;;  %v269_v40 = vshll.u32 %v2130_v26, 16  ;;  %v2161_v54 = vld [vmem:[%s2091_s11 + $0x2c] sm:$0x1] }
  0x22   : > { %v239_v41 = vrot.slane %v238_v33, 4  ;;  %v257_v42 = vrot.slane %v255_v34, 5  ;;  %v262_v43 = vrot.slane %v260_v35, 4  ;;  %v265_v44 = vrot.slane %v263_v36, 5  ;;  %v2165_v59 = vld [vmem:[%s2091_s11 + $0x30] sm:$0xf] }
  0x23   : > { %v230_v45 = vsel %vm2142_vm3, %v225_v37, %v229_v20  ;;  %v252_v46 = vor.u32 %v251_v39, %v248_v38  ;;  %v271_v47 = vrot.slane %v269_v40, 5  ;;  %v274_v48 = vshrl.u32 %v2133_v28, 16  ;;  %v2169_v0 = vld [vmem:[%s2091_s11 + $0x34] sm:$0x1]  ;;  %v2178_v13 = vld [vmem:[%s2091_s11 + $0x38] sm:$0xf] }
  0x24   : > { %v244_v50 = vsel %vm2142_vm3, %v239_v41, %v243_v24  ;;  %v266_v51 = vor.u32 %v265_v44, %v262_v43  ;;  %v277_v52 = vshll.u32 %v2133_v28, 16  ;;  %v283_v53 = vshll.u32 %v2136_v29, 16  ;;  %v2184_v20 = vld [vmem:[%s2091_s11 + $0x3c] sm:$0x1]  ;;  %v1904_v24 = vld [vmem:[%s2480_s1 + $0x8] sm:$0xff]  }
  0x25   : > { %v1480_v55 = vcombine.low %v230_v45, %v244_v50  ;;  %v253_v56 = vrot.slane %v252_v46, 4  ;;  %v276_v57 = vrot.slane %v274_v48, 4  ;;  %v566_v58 = vrot.slane %v2124_v22, 5  ;;  %v1903_v40 = vld [vmem:[%s2480_s1 + $0x58] sm:$0xff]  }
  0x26   : > { %v267_v60 = vrot.slane %v266_v51, 4  ;;  %v279_v61 = vrot.slane %v277_v52, 5  ;;  %v285_v62 = vrot.slane %v283_v53, 5  ;;  %v570_v63 = vrot.slane %v2130_v26, 5  ;;  %v1915_v48 = vld [vmem:[%s2480_s1 + $0x78] sm:$0xff]  }
  0x27   : > { %1683 = vmatprep.mubr.msk.bf16.mxu1 %vm358_vm2, %v1480_v55  ;;  %v258_v2 = vsel %vm2142_vm3, %v253_v56, %v257_v42  ;;  %v574_v10 = vrot.slane %v2136_v29, 5  ;;  %v288_v11 = vshrl.u32 %v2154_v49, 16  ;;  %v291_v12 = vshll.u32 %v2154_v49, 16 }
  0x28   : > { %v272_v14 = vsel %vm2142_vm3, %v267_v60, %v271_v47  ;;  %v280_v15 = vor.u32 %v279_v61, %v276_v57  ;;  %v1540_v18 = vcombine.low %v244_v50, %v258_v2  ;;  %v297_v19 = vshll.u32 %v2161_v54, 16 }
  0x29   : > { %v2186_v21 = vcombine.low %v258_v2, %v272_v14  ;;  %v290_v22 = vrot.slane %v288_v11, 4  ;;  %v293_v23 = vrot.slane %v291_v12, 5  ;;  %v302_v27 = vshrl.u32 %v2165_v59, 16 }
  0x2a   : > { %v281_v30 = vrot.slane %v280_v15, 4  ;;  %1731 = vmatprep.mubr.msk.bf16.mxu0 %vm358_vm2, %v1540_v18  ;;  %v299_v31 = vrot.slane %v297_v19, 5  ;;  %v305_v33 = vshll.u32 %v2165_v59, 16  ;;  %v311_v34 = vshll.u32 %v2169_v0, 16 }
  0x2b   : > { %1684 = vmatmul.mubr.msk.bf16.vlgmr.msra.gmra.mrb[0].mxu1 %vm358_vm2, %v2186_v21  ;;  %v294_v35 = vor.u32 %v293_v23, %v290_v22  ;;  %v304_v36 = vrot.slane %v302_v27, 4  ;;  %v316_v37 = vshrl.u32 %v2178_v13, 16  ;;  %v319_v38 = vshll.u32 %v2178_v13, 16 }
  0x2c   : > { %v286_v39 = vsel %vm2142_vm3, %v281_v30, %v285_v62  ;;  %1692 = vmatpush3.bf16.msra.mxu1 %v2085_v4  ;;  %v307_v41 = vrot.slane %v305_v33, 5  ;;  %v313_v42 = vrot.slane %v311_v34, 5  ;;  %v325_v43 = vshll.u32 %v2184_v20, 16  ;;  %v2215_v4 = vld [vmem:[%s2480_s1 + $0x20] sm:$0xff]  }
  0x2d   : > { %v1541_v44 = vcombine.low %v272_v14, %v286_v39  ;;  %v295_v45 = vrot.slane %v294_v35, 4  ;;  %1693 = vmatprep.subr.bf16.mxu1 %v1904_v24  ;;  %v318_v46 = vrot.slane %v316_v37, 4  ;;  %v321_v47 = vrot.slane %v319_v38, 5  ;;  %v1905_v14 = vld [vmem:[%s2480_s1 + $0x60] sm:$0xff]   ;;  %v1909_v35 = vld [vmem:[%s2480_s1 + $0x68] sm:$0xff]  }
  0x2e   : > { %v308_v50 = vor.u32 %v307_v41, %v304_v36  ;;  %v327_v51 = vrot.slane %v325_v43, 5  ;;  %v1501_v52 = vrot.slane %v2105_v8, 9  ;;  %v1502_v53 = vrot.slane %v2120_v17, 9  ;;  %v208_v41 = vld [vmem:[%s2091_s11 + $0x48] sm:$0xf]  ;;  %v1913_v43 = vld [vmem:[%s2480_s1 + $0x70] sm:$0xff]  }
  0x2f   : > { %1732 = vmatmul.mubr.msk.bf16.vlgmr.msra.gmra.mrb[0].mxu0 %vm358_vm2, %v1541_v44  ;;  %v2222_v55 = vsel %vm2142_vm3, %v295_v45, %v299_v31  ;;  %v322_v56 = vor.u32 %v321_v47, %v318_v46  ;;  %v1503_v57 = vrot.slane %v2127_v25, 9  ;;  %v1504_v60 = vrot.slane %v2133_v28, 9  ;;  %v2285_v31 = vld [vmem:[%s2091_s11 + $0x44] sm:$0x1] }
  0x30   : > { %1740 = vmatpush3.bf16.msra.mxu0 %v2096_v5  ;;  %v2228_v61 = vcombine.low %v286_v39, %v2222_v55  ;;  %v309_v62 = vrot.slane %v308_v50, 4  ;;  %1694 = vmatpush3.bf16.msra.mxu1 %v1904_v24  ;;  %v2234_v2 = vsel %vm2208_vm6, %v1501_v52, %v562_v16  ;;  %v2238_v11 = vsel %vm2208_vm6, %v1502_v53, %v566_v58  ;;  %v1914_v50 = vld [vmem:[%s2480_s1 + $0x30] sm:$0xff]  }
  0x31   : > { %1741 = vmatprep.subr.bf16.mxu0 %v1903_v40  ;;  %v323_v12 = vrot.slane %v322_v56, 4  ;;  %v1555_v5 = vcombine.low %v2234_v2, %v2238_v11  ;;  %1703 = vmatprep.subr.bf16.mxu1 %v2215_v4  ;;  %v1490_v16 = vcombine.low %v2099_v6, %v2105_v8  ;;  %v1505_v58 = vrot.slane %v2154_v49, 9 }
  0x32   : > { %1687 = vmatprep.mubr.msk.bf16.mxu1 %vm358_vm2, %v2228_v61  ;;  %v2250_v9 = vsel %vm2142_vm3, %v309_v62, %v313_v42  ;;  %v578_v18 = vrot.slane %v2161_v54, 5  ;;  %v1506_v19 = vrot.slane %v2165_v59, 9  ;;  %v582_v22 = vrot.slane %v2169_v0, 5  ;;  %v2276_v54 = vld [vmem:[%s2091_s11 + $0x40] sm:$0xf] }
  0x33   : > { %v2257_v15 = vsel %vm2142_vm3, %v323_v12, %v327_v51  ;;  %1743 = vmatprep.mubr.msk.bf16.mxu0 %vm358_vm2, %v1555_v5  ;;  %v571_v24 = vsel %vm2208_vm6, %v1503_v57, %v570_v63  ;;  %v575_v27 = vsel %vm2208_vm6, %v1504_v60, %v574_v10  ;;  %v1507_v29 = vrot.slane %v2178_v13, 9  ;;  %v209_v42 = vld [vmem:[%s2091_s11 + $0x4c] sm:$0x1]  ;;  %v1917_v60 = vld [vmem:[%s2480_s1 + $0x38] sm:$0xff]   ;;  %s1394_s11 = sshll.u32 %s2409_s30, 4  ;;  %s2428_s11 = int_to_ptr.vmem [resolvable:$true] %s1394_s11 }
  0x34   : > { %1742 = vmatpush3.bf16.msra.mxu0 %v1903_v40  ;;  %v2265_v23 = vcombine.low %v2250_v9, %v2257_v15  ;;  %v579_v0 = vsel %vm2208_vm6, %v1505_v58, %v578_v18  ;;  %v2282_v30 = vsel %vm2208_vm6, %v1506_v19, %v582_v22  ;;  %v1556_v26 = vcombine.low %v571_v24, %v575_v27  ;;  %v1911_v40 = vld [vmem:[%s2480_s1 + $0x28] sm:$0xff]   ;;  %s1924_s24 = scalar_lea.vmem %s2428_s11, 1024  ;;  %p1931_p0 = scmp.lt.s32.totalorder %s2428_s11, %s1929_s26 }
  0x35   : > { %1751 = vmatprep.subr.bf16.mxu0 %v1905_v14  ;;  %v1557_v63 = vcombine.low %v579_v0, %v2282_v30  ;;  %v586_v10 = vrot.slane %v2184_v20, 5  ;;  %v1550_v33 = vrot.slane %v2276_v54, 9  ;;  %v934_v34 = vrot.slane %v2285_v31, 5  ;;  %p1925_p11 = scmp.ne.s32.totalorder %s2428_s11, %s1924_s24  ;;  %p1932_p1 = scmp.lt.s32.totalorder %s1930_s27, %s1924_s24 }
  0x36   : > { %1688 = vmatmul.mubr.msk.bf16.gmra.mrb[4].mxu1 %vm358_vm2, %v2265_v23  ;;  %v1491_v36 = vcombine.low %v2120_v17, %v2127_v25  ;;  %v558_v37 = vrot.slane %v2102_v7, 5  ;;  %v1492_v38 = vcombine.low %v2133_v28, %v2154_v49  ;;  %v1500_v7 = vrot.slane %v2099_v6, 9 }
  0x37   : > { %1695 = vmatprep.mubr.msk.bf16.mxu1 %vm358_vm2, %v1490_v16  ;;  %v587_v20 = vsel %vm2208_vm6, %v1507_v29, %v586_v10  ;;  %v2309_v39 = vsel %vm2208_vm6, %v1550_v33, %v934_v34  ;;  %v1587_v44 = vrot.slane %v208_v41, 9  ;;  %v1251_v45 = vrot.slane %v209_v42, 5  ;;  %p1926_p12 = pnand %p1925_p11, %p2049_p5  ;;  %p1933_p2 = por %p1932_p1, %p1931_p0 }
  0x38   : > { %v1558_v46 = vcombine.low %v587_v20, %v2309_v39  ;;  %v559_v47 = vsel %vm2208_vm6, %v1500_v7, %v558_v37  ;;  %v1513_v52 = vcombine.low %v2238_v11, %v571_v24  ;;  %v1514_v53 = vcombine.low %v575_v27, %v579_v0  ;;  %v1918_v11 = vld [vmem:[%s2480_s1 + $0x80] sm:$0xff]  }
  0x39   : > { %v2326_v6 = vsel %vm2208_vm6, %v1587_v44, %v1251_v45  ;;  %v1512_v51 = vcombine.low %v559_v47, %v2234_v2  ;;  %v1140_v56 = vshrl.u32 %v208_v41, 16  ;;  %v1143_v57 = vshll.u32 %v208_v41, 16  ;;  %v1623_v44 = vld [vmem:[%s188_s7 + $0x10] sm:$0xff]   ;;  %p1927_p13 = pneg %p1926_p12 }
  0x3a   : > { %v811_v62 = vshrl.u32 %v2276_v54, 16  ;;  %v814_v2 = vshll.u32 %v2276_v54, 16  ;;  %v1569_v12 = vcombine.low %v2276_v54, %v208_v41  ;;  %v1515_v18 = vcombine.low %v2282_v30, %v587_v20 }
  0x3b   : > { %1744 = vmatmul.mubr.msk.bf16.vlgmr.msra.gmra.mrb[0].mxu0 %vm358_vm2, %v1556_v26  ;;  %v1142_v16 = vrot.slane %v1140_v56, 4  ;;  %v1145_v58 = vrot.slane %v1143_v57, 5  ;;  %v1526_v19 = vcombine.low %v2105_v8, %v2120_v17  ;;  %v820_v24 = vshll.u32 %v2285_v31, 16  ;;  %v1921_v8 = vld [vmem:[%s2480_s1 + $0x88] sm:$0xff]   ;;  %p1934_p3 = pnand %p1933_p2, %p1927_p13 }
  0x3c   : > { %1752 = vmatpush3.bf16.msra.mxu0 %v1905_v14  ;;  %1747 = vmatprep.mubr.msk.bf16.mxu0 %vm358_vm2, %v1557_v63  ;;  %v813_v5 = vrot.slane %v811_v62, 4  ;;  %v816_v14 = vrot.slane %v814_v2, 5  ;;  %v1149_v0 = vshll.u32 %v209_v42, 16  ;;  %v1527_v17 = vcombine.low %v2127_v25, %v2133_v28  ;;  %v1624_v42 = vld [vmem:[%s188_s7 + $0x18] sm:$0xff]  }
  0x3d   : > { %1753 = vmatprep.subr.bf16.mxu0 %v1909_v35  ;;  %v1146_v27 = vor.u32 %v1145_v58, %v1142_v16  ;;  %v822_v26 = vrot.slane %v820_v24, 5  ;;  %v1529_v28 = vcombine.low %v2178_v13, %v2276_v54  ;;  %v1542_v32 = vcombine.low %v2222_v55, %v2250_v9  ;;  %v1607_v9 = vld [vmem:[%s188_s7] sm:$0xff]  }
  0x3e   : > { %1696 = vmatmul.mubr.msk.bf16.vlgmr.msra.gmra.mrb[0].mxu1 %vm358_vm2, %v1491_v36  ;;  %v817_v22 = vor.u32 %v816_v14, %v813_v5  ;;  %v1151_v63 = vrot.slane %v1149_v0, 5  ;;  %v1608_v54 = vunpack.c.l.bf16 %v1607_v9  ;;  %v1617_v62 = vunpack.c.h.bf16 %v1623_v44 }
  0x3f   : > { %1704 = vmatpush3.bf16.msra.mxu1 %v2215_v4  ;;  %1699 = vmatprep.mubr.msk.bf16.mxu1 %vm358_vm2, %v1492_v38  ;;  %v1493_v4 = vcombine.low %v2165_v59, %v2178_v13  ;;  %v1147_v29 = vrot.slane %v1146_v27, 4 }
  0x40   : > { %1754 = vmatpush3.bf16.msra.mxu0 %v1909_v35  ;;  %1705 = vmatprep.subr.bf16.mxu1 %v1911_v40  ;;  %v818_v30 = vrot.slane %v817_v22, 4 }
  0x41   : > { %1763 = vmatprep.subr.bf16.mxu0 %v1913_v43  ;;  %v1152_v10 = vsel %vm2142_vm3, %v1147_v29, %v1151_v63 }
  0x42   : > { %v823_v31 = vsel %vm2142_vm3, %v818_v30, %v822_v26 }
  0x43   : > { %1748 = vmatmul.mubr.msk.bf16.gmra.mrb[4].mxu0 %vm358_vm2, %v1558_v46  ;;  %1706 = vmatpush3.bf16.msra.mxu1 %v1911_v40  ;;  %v1580_v25 = vcombine.low %v823_v31, %v1152_v10 }
  0x44   : > { %1755 = vmatprep.mubr.msk.bf16.mxu0 %vm358_vm2, %v1491_v36  ;;  %1715 = vmatprep.subr.bf16.mxu1 %v1914_v50 }
  0x46   : > { %1700 = vmatmul.mubr.msk.bf16.gmra.mrb[4].mxu1 %vm358_vm2, %v1493_v4 }
  0x47   : > { %1707 = vmatprep.mubr.msk.bf16.mxu1 %vm358_vm2, %v1512_v51 }
  0x4b   : > { %1756 = vmatmul.mubr.msk.bf16.vlgmr.msra.gmra.mrb[0].mxu0 %vm358_vm2, %v1492_v38  ;;  %v1609_v38 = vunpack.c.h.bf16 %v1607_v9 }
  0x4c   : > { %1764 = vmatpush3.bf16.msra.mxu0 %v1913_v43  ;;  %1759 = vmatprep.mubr.msk.bf16.mxu0 %vm358_vm2, %v1493_v4  ;;  %v1616_v4 = vunpack.c.l.bf16 %v1623_v44 }
  0x4d   : > { %1765 = vmatprep.subr.bf16.mxu0 %v1915_v48 }
  0x4e   : > { %1708 = vmatmul.mubr.msk.bf16.vlgmr.msra.gmra.mrb[0].mxu1 %vm358_vm2, %v1513_v52 }
  0x4f   : > { %1716 = vmatpush3.bf16.msra.mxu1 %v1914_v50  ;;  %1711 = vmatprep.mubr.msk.bf16.mxu1 %vm358_vm2, %v1514_v53 }
  0x50   : > { %1766 = vmatpush3.bf16.msra.mxu0 %v1915_v48  ;;  %1717 = vmatprep.subr.bf16.mxu1 %v1917_v60 }
  0x51   : > { %1775 = vmatprep.subr.bf16.mxu0 %v1918_v11 }
  0x53   : > { %1760 = vmatmul.mubr.msk.bf16.gmra.mrb[4].mxu0 %vm358_vm2, %v1569_v12  ;;  %1718 = vmatpush3.bf16.msra.mxu1 %v1917_v60 }
  0x54   : > { %1767 = vmatprep.mubr.msk.bf16.mxu0 %vm358_vm2, %v2186_v21  ;;  %1787 = vmatprep.subr.bf16.mxu1 %v2066_v1  ;;  %v1528_v21 = vcombine.low %v2154_v49, %v2165_v59 }
  0x56   : > { %1712 = vmatmul.mubr.msk.bf16.gmra.mrb[4].mxu1 %vm358_vm2, %v1515_v18 }
  0x57   : > { %1719 = vmatprep.mubr.msk.bf16.mxu1 %vm358_vm2, %v1526_v19 }
  0x5b   : > { %1768 = vmatmul.mubr.msk.bf16.vlgmr.msra.gmra.mrb[0].mxu0 %vm358_vm2, %v2228_v61  ;;  %v1622_v61 = vld [vmem:[%s188_s7 + $0x8] sm:$0xff]  }
  0x5c   : > { %1776 = vmatpush3.bf16.msra.mxu0 %v1918_v11  ;;  %1771 = vmatprep.mubr.msk.bf16.mxu0 %vm358_vm2, %v2265_v23  ;;  %v1613_v35 = vunpack.c.h.bf16 %v1622_v61 }
  0x5d   : > { %1777 = vmatprep.subr.bf16.mxu0 %v1921_v8 }
  0x5e   : > { %1720 = vmatmul.mubr.msk.bf16.vlgmr.msra.gmra.mrb[0].mxu1 %vm358_vm2, %v1527_v17 }
  0x5f   : > { %1789 = vmatpush3.bf16.msra.mxu1 %v2066_v1  ;;  %1723 = vmatprep.mubr.msk.bf16.mxu1 %vm358_vm2, %v1528_v21  ;;  %v1543_v1 = vcombine.low %v2257_v15, %v823_v31  ;;  %v1612_v15 = vunpack.c.l.bf16 %v1622_v61 }
  0x60   : > { %1778 = vmatpush3.bf16.msra.mxu0 %v1921_v8  ;;  %1788 = vmatprep.subr.bf16.mxu1 %v2078_v3 }
  0x63   : > { %1772 = vmatmul.mubr.msk.bf16.gmra.mrb[4].mxu0 %vm358_vm2, %v1580_v25  ;;  %1790 = vmatpush3.bf16.msra.mxu1 %v2078_v3  ;;  %v1592_v3 = vcombine.low %v2309_v39, %v2326_v6  ;;  %v1620_v6 = vunpack.c.l.bf16 %v1624_v42 }
  0x64   : > { %1779 = vmatprep.mubr.msk.bf16.mxu0 %vm358_vm2, %v1513_v52 }
  0x66   : > { %1724 = vmatmul.mubr.msk.bf16.gmra.mrb[4].mxu1 %vm358_vm2, %v1529_v28 }
  0x67   : > { %1735 = vmatprep.mubr.msk.bf16.mxu1 %vm358_vm2, %v1542_v32 }
  0x6b   : > { %1780 = vmatmul.mubr.msk.bf16.vlgmr.msra.gmra.mrb[0].mxu0 %vm358_vm2, %v1514_v53  ;;  %v1621_v53 = vunpack.c.h.bf16 %v1624_v42 }
  0x6c   : > { %1783 = vmatprep.mubr.msk.bf16.mxu0 %vm358_vm2, %v1515_v18 }
  0x72   : > { %1736 = vmatmul.mubr.msk.bf16.vlgmr.msra.gmra.mrb[4].mxu1 %vm358_vm2, %v1543_v1 }
  0x73   : > { %1784 = vmatmul.mubr.msk.bf16.gmra.mrb[4].mxu0 %vm358_vm2, %v1592_v3 }
 0x131   : > { %v1721_v49 = vpop.f32.mrb[0].mxu1 }
 0x132   : > { %v771_v59 = vpop.f32.mrb[1].mxu1 }
 0x133   : > { %v1722_v13 = vpop.f32.mrb[2].mxu1 }
 0x134   : > { %v774_v55 = vpop.f32.mrb[3].mxu1 }
 0x13e   : > { %v1781_v23 = vpop.f32.mrb[0].mxu0 }
 0x13f   : > { %v1791_v33 = vadd.f32 %v1781_v23, %v1721_v49  ;;  %v1309_v34 = vpop.f32.mrb[1].mxu0 }
 0x140   : > { %v1792_v36 = vadd.f32 %v1309_v34, %v771_v59  ;;  %v1782_v37 = vpop.f32.mrb[2].mxu0 }
 0x141   : > { %v1366_v20 = vadd.f32 %v1791_v33, %v1612_v15  ;;  %v1793_v39 = vadd.f32 %v1782_v37, %v1722_v13  ;;  %v1312_v40 = vpop.f32.mrb[3].mxu0 }
 0x142   : > { %v1364_v7 = vadd.f32 %v1792_v36, %v1608_v54  ;;  %v1794_v41 = vadd.f32 %v1312_v40, %v774_v55 }
 0x143   : > { %1374 = vst.msk [vmem:[%s2409_s30 + $0x10] sm:$0xff] %vm358_vm2, %v1366_v20  ;;  %v1367_v43 = vadd.f32 %v1793_v39, %v1613_v35 }
 0x144   : > { %1372 = vst.msk [vmem:[%s2409_s30] sm:$0xff] %vm358_vm2, %v1364_v7  ;;  %v1365_v45 = vadd.f32 %v1794_v41, %v1609_v38 }
 0x145   : > { %1375 = vst.msk [vmem:[%s2409_s30 + $0x18] sm:$0xff] %vm358_vm2, %v1367_v43  ;;  %v1737_v46 = vpop.f32.mrb[4].mxu1 }
 0x146   : > { %1373 = vst.msk [vmem:[%s2409_s30 + $0x8] sm:$0xff] %vm358_vm2, %v1365_v45  ;;  %v1785_v47 = vpop.f32.mrb[4].mxu0  ;;  %v908_v50 = vpop.f32.mrb[5].mxu1 }
 0x147   : > { %v1795_v51 = vadd.f32 %v1785_v47, %v1737_v46  ;;  %v1325_v48 = vpop.f32.mrb[5].mxu0  ;;  %v1738_v52 = vpop.f32.mrb[6].mxu1 }
 0x148   : > { %v1796_v56 = vadd.f32 %v1325_v48, %v908_v50  ;;  %v1786_v57 = vpop.f32.mrb[6].mxu0  ;;  %v911_v60 = vpop.f32.mrb[7].mxu1 }
 0x149   : > { %v1370_v2 = vadd.f32 %v1795_v51, %v1620_v6  ;;  %v1797_v11 = vadd.f32 %v1786_v57, %v1738_v52  ;;  %v1328_v12 = vpop.f32.mrb[7].mxu0 }
 0x14a   : > { %v1368_v5 = vadd.f32 %v1796_v56, %v1616_v4  ;;  %v1798_v14 = vadd.f32 %v1328_v12, %v911_v60 }
 0x14b   : > { %1378 = vst.msk [vmem:[%s2409_s30 + $0x30] sm:$0xff] %vm358_vm2, %v1370_v2  ;;  %v1371_v16 = vadd.f32 %v1797_v11, %v1621_v53 }
 0x14c   : > { %1376 = vst.msk [vmem:[%s2409_s30 + $0x20] sm:$0xff] %vm358_vm2, %v1368_v5  ;;  %v1369_v58 = vadd.f32 %v1798_v14, %v1617_v62 }
 0x14d   : > { %1379 = vst.msk [vmem:[%s2409_s30 + $0x38] sm:$0xff] %vm358_vm2, %v1371_v16 }
 0x14e   : > { %1377 = vst.msk [vmem:[%s2409_s30 + $0x28] sm:$0xff] %vm358_vm2, %v1369_v58 }
 0x14f   : > { %1937 = shalt.err (!%p1934_p3)
}
 0x150   : > { %s1938_s28 = scalar_lea.hbm %s2426_s20, 1024  ;;  %s1942_s5 = scalar_lea.hbm %s2482_s3, 2048 }
 0x151   : > { %p1939_p4 = scmp.ne.s32.totalorder %s2426_s20, %s1938_s28  ;;  %p1943_p9 = scmp.lt.u32.totalorder %s2426_s20, %s2482_s3 }
 0x152   : > { %p1944_p10 = scmp.lt.u32.totalorder %s1942_s5, %s1938_s28  ;;  %p1946_p12 = scmp.lt.u32.totalorder %s1938_s28, %s2426_s20 }
 0x153   : > { %p1940_p7 = pnand %p1939_p4, %p2049_p5 }
 0x154   : > { %p1945_p11 = por %p1944_p10, %p1943_p9 }
 0x155   : > { %p1941_p8 = pneg %p1940_p7 }
 0x156   : > { %p1947_p13 = por %p1946_p12, %p1945_p11 }
 0x158   : > { %p1948_p0 = pnand %p1947_p13, %p1941_p8 }
 0x15a   : > { %1951 = shalt.err (!%p1948_p0)
}
 0x15b   : > { %s1989_s8 = smov 128   ;;  %s1990_s9 = smov 8  }
 0x15c   : > { %1856 = dma.vmem_to_hbm [thread:$0]  (%p2049_p5), %s2428_s11, 1024, %s2426_s20, %s2438_s16, %s1989_s8, %s1989_s8, %s1990_s9  }
 0x15d PF: > { %p1862_p1 = scmp.ge.s32.totalorder %s1986_s15, 2  ;;  %s1409_s30 = sand.u32 1, %s1974_s12  }
 0x15e   : > { %s1410_s10 = scalar_lea.sflag [#allocation3], %s1409_s30 }
 0x15f   : > { %p1859_p2 = pnand %p1862_p1, %p2053_p6 }
 0x161   : > { %1969 = dma.done.wait (!%p1859_p2), %s1410_s10, 1024  }
 0x162   : > { %1971 = vsyncadd (!%p1859_p2), %s1410_s10, 4294966272  ;;  %p13_p3 = scmp.ge.s32.totalorder %s2036_s18, 4   ;;  %s2489_s12 = smov %s1978_s13 }
 0x163   : > { %s2490_s13 = smov %s1982_s14  ;;  %s2491_s14 = smov %s2047_s21 }
 0x164   : > { %s2492_s15 = smov %s2036_s18  ;;  %15 = sbr.rel (!%p13_p3) target bundleno = 3 (0x3), region = 78 }
 0x16b   :  { %1415 = vsyncpa [#allocation3], 1 }
 0x16c   :  { %1417 = vsyncpa [#allocation3 + $0x1], 1 }

// kernel: _lambda_.2
= control target key start
LH: loop header
LB: loop body
LE: loop exit
PB: predicated region body
PF: predicated region fallthrough
CT: control target
= control target key end

     0   :  { %s3278_s24 = smov 0   ;;  %s4279_s0 = inlined_call_operand.vmem [shape: f32[2,4,9,9,16], index: 0, kind: input, shape index: {}]   ;;  %s4280_s1 = inlined_call_operand.vmem [shape: f32[1,4,9,9,1], index: 1, kind: input, shape index: {}]   ;;  %s4281_s2 = inlined_call_operand.vmem [shape: bf16[9,16,32], index: 2, kind: input, shape index: {}]   ;;  %s4282_s3 = inlined_call_operand.vmem [shape: f32[1,16], index: 3, kind: input, shape index: {}]   ;;  %s4283_s4 = inlined_call_operand.vmem [shape: f32[1,16], index: 4, kind: input, shape index: {}]   ;;  %s4284_s5 = inlined_call_operand.vmem [shape: f32[1,32], index: 5, kind: input, shape index: {}]   ;;  %s4285_s6 = inlined_call_operand.vmem [shape: f32[1,32], index: 6, kind: input, shape index: {}]   ;;  %s4286_s7 = inlined_call_operand.vmem [shape: bf16[2,10,10,32], index: 7, kind: output, shape index: {}]  }
   0x1 LB: > { %s2753_s25 = sadd.s32 4294967295, %s3235_s24   ;;  %p2757_p0 = scmp.ge.s32.totalorder %s3235_s24, 1  ;;  %s3235_s24 = sphi %s3278_s24, %s17_s24  }
   0x2   : > { %p237_p1 = scmp.lt.s32.totalorder %s3235_s24, 3 }
   0x4   : > { %p238_p2 = pnand %p2757_p0, %p237_p1 }
   0x5   : > { %v754_v0 = vld [vmem:[%s4280_s1 + $0x1b0] sm:$0xff] (!%p238_p2)  ;;  %v4287_v2 = vmov (!%p238_p2), 0   ;;  %v756_v3 = vld [vmem:[%s4280_s1 + $0x1c0] sm:$0xff] (!%p238_p2)  ;;  %v3217_v13 = vld [vmem:[%s4281_s2 + $0x8] sm:$0xff] (!%p238_p2)   ;;  %p269_p3 = scmp.lt.s32.totalorder (!%p238_p2), %s2753_s25, 1 }
   0x6   : > { %241 = sbr.rel (%p238_p2) target bundleno = 504 (0x1f8), region = 48  ;;  %v720_v1 = vld [vmem:[%s4280_s1 + $0x90] sm:$0xff] (!%p238_p2)  ;;  %3216 = vset.pattern.permute.xlu1 (!%p238_p2), %v4287_v2  ;;  %3215 = vset.pattern.permute.xlu0 (!%p238_p2), %v4287_v2  ;;  %v722_v4 = vld [vmem:[%s4280_s1 + $0xa0] sm:$0xff] (!%p238_p2)  ;;  %v741_v15 = vld [vmem:[%s4280_s1 + $0x138] sm:$0x1] (!%p238_p2) }
   0x7   : > { %1032 = vperm.xlu1 (!%p238_p2), %3216, %v754_v0   ;;  %862 = vperm.xlu0 (!%p238_p2), %3215, %v720_v1   ;;  %v726_v5 = vld [vmem:[%s4280_s1 + $0xc0] sm:$0xff] (!%p238_p2)  ;;  %v724_v6 = vld [vmem:[%s4280_s1 + $0xb0] sm:$0xff] (!%p238_p2)  ;;  %v739_v16 = vld [vmem:[%s4280_s1 + $0x128] sm:$0x1] (!%p238_p2) }
   0x8   : > { %v740_v7 = vld [vmem:[%s4280_s1 + $0x130] sm:$0xff] (!%p238_p2)  ;;  %v738_v8 = vld [vmem:[%s4280_s1 + $0x120] sm:$0xff] (!%p238_p2)  ;;  %3048 = vmatprep.subr.bf16.mxu1 (!%p238_p2), %v3217_v13  ;;  %v745_v17 = vld [vmem:[%s4280_s1 + $0x158] sm:$0x1] (!%p238_p2) }
   0x9   : > { %v760_v9 = vld [vmem:[%s4280_s1 + $0x1e0] sm:$0xff] (!%p238_p2)  ;;  %v758_v10 = vld [vmem:[%s4280_s1 + $0x1d0] sm:$0xff] (!%p238_p2)  ;;  %3049 = vmatpush3.bf16.msra.mxu1 (!%p238_p2), %v3217_v13  ;;  %v743_v18 = vld [vmem:[%s4280_s1 + $0x148] sm:$0x1] (!%p238_p2) }
   0xa   : > { %v744_v11 = vld [vmem:[%s4280_s1 + $0x150] sm:$0xff] (!%p238_p2)  ;;  %v742_v12 = vld [vmem:[%s4280_s1 + $0x140] sm:$0xff] (!%p238_p2)  ;;  %v3357_v23 = vld [vmem:[%s4281_s2 + $0x28] sm:$0xff] (!%p238_p2)  }
   0xb   : > { %1042 = vperm.xlu1 (!%p238_p2), %3216, %v756_v3   ;;  %872 = vperm.xlu0 (!%p238_p2), %3215, %v722_v4   ;;  %v3218_v14 = vld [vmem:[%s4281_s2 + $0x20] sm:$0xff] (!%p238_p2)   ;;  %v728_v20 = vld [vmem:[%s4280_s1 + $0xd0] sm:$0xff] (!%p238_p2)  ;;  %v749_v28 = vld [vmem:[%s4280_s1 + $0x178] sm:$0x1] (!%p238_p2) }
   0xc   : > { %3088 = vmatprep.subr.bf16.mxu0 (!%p238_p2), %v3218_v14  ;;  %v730_v19 = vld [vmem:[%s4280_s1 + $0xe0] sm:$0xff] (!%p238_p2)  ;;  %v732_v22 = vld [vmem:[%s4280_s1 + $0xf0] sm:$0xff] (!%p238_p2)  ;;  %v747_v29 = vld [vmem:[%s4280_s1 + $0x168] sm:$0x1] (!%p238_p2) }
   0xd   : > { %3089 = vmatpush3.bf16.msra.mxu0 %v3218_v14  ;;  %v734_v21 = vld [vmem:[%s4280_s1 + $0x100] sm:$0xff]  ;;  %v748_v24 = vld [vmem:[%s4280_s1 + $0x170] sm:$0xff]  ;;  %v753_v30 = vld [vmem:[%s4280_s1 + $0x198] sm:$0x1]  ;;  %s4301_s25 = smov (!%p269_p3, %s2753_s25), 1 }
   0xe   : > { %v746_v25 = vld [vmem:[%s4280_s1 + $0x160] sm:$0xff]  ;;  %3098 = vmatprep.subr.bf16.mxu0 %v3357_v23  ;;  %v752_v26 = vld [vmem:[%s4280_s1 + $0x190] sm:$0xff]  ;;  %v751_v31 = vld [vmem:[%s4280_s1 + $0x188] sm:$0x1]  ;;  %s3204_s19 = smul.u32 576, %s4301_s25 }
   0xf   : > { %892 = vperm.xlu1 %3216, %v726_v5   ;;  %882 = vperm.xlu0 %3215, %v724_v6   ;;  %v750_v27 = vld [vmem:[%s4280_s1 + $0x180] sm:$0xff]  ;;  %v704_v32 = vld [vmem:[%s4280_s1 + $0x10] sm:$0xff]  ;;  %v705_v39 = vld [vmem:[%s4280_s1 + $0x18] sm:$0x1] }
  0x10   : > { %v702_v33 = vld [vmem:[%s4280_s1] sm:$0xff]  ;;  %v708_v34 = vld [vmem:[%s4280_s1 + $0x30] sm:$0xff]  ;;  %v703_v40 = vld [vmem:[%s4280_s1 + $0x8] sm:$0x1]  ;;  %s3460_s28 = scalar_lea.vmem %s4279_s0, %s3204_s19 }
  0x11   : > { %v706_v35 = vld [vmem:[%s4280_s1 + $0x20] sm:$0xff]  ;;  %v712_v37 = vld [vmem:[%s4280_s1 + $0x50] sm:$0xff]  ;;  %v709_v43 = vld [vmem:[%s4280_s1 + $0x38] sm:$0x1] }
  0x12   : > { %v3399_v36 = vld [vmem:[%s4281_s2] sm:$0xff]   ;;  %v716_v41 = vld [vmem:[%s4280_s1 + $0x70] sm:$0xff]  ;;  %v707_v44 = vld [vmem:[%s4280_s1 + $0x28] sm:$0x1] }
  0x13   : > { %962 = vperm.xlu1 %3216, %v740_v7   ;;  %952 = vperm.xlu0 %3215, %v738_v8   ;;  %v710_v38 = vld [vmem:[%s4280_s1 + $0x40] sm:$0xff]  ;;  %v713_v45 = vld [vmem:[%s4280_s1 + $0x58] sm:$0x1]  ;;  %v711_v46 = vld [vmem:[%s4280_s1 + $0x48] sm:$0x1] }
  0x14   : > { %3058 = vmatprep.subr.bf16.mxu1 %v3399_v36  ;;  %v714_v42 = vld [vmem:[%s4280_s1 + $0x60] sm:$0xff]  ;;  %v717_v47 = vld [vmem:[%s4280_s1 + $0x78] sm:$0x1]  ;;  %v715_v48 = vld [vmem:[%s4280_s1 + $0x68] sm:$0x1] }
  0x15   : > { %v736_v49 = vld [vmem:[%s4280_s1 + $0x110] sm:$0xff]  ;;  %v718_v50 = vld [vmem:[%s4280_s1 + $0x80] sm:$0xff]  ;;  %v719_v52 = vld [vmem:[%s4280_s1 + $0x88] sm:$0x1] }
  0x16   : > { %v762_v51 = vld [vmem:[%s4280_s1 + $0x1f0] sm:$0xff]  ;;  %v764_v54 = vld [vmem:[%s4280_s1 + $0x200] sm:$0xff] }
  0x17   : > { %1062 = vperm.xlu1 %3216, %v760_v9   ;;  %1052 = vperm.xlu0 %3215, %v758_v10   ;;  %v766_v53 = vld [vmem:[%s4280_s1 + $0x210] sm:$0xff]  ;;  %v3472_v56 = vld [vmem:[%s4282_s3] ss:$0 sm:$0xff] }
  0x18   : > { %v332_v55 = vld [vmem:[%s3460_s28 + $0x1b0] sm:$0xff]  ;;  %v334_v58 = vld [vmem:[%s3460_s28 + $0x1c0] sm:$0xff] }
  0x19   : > { %v298_v57 = vld [vmem:[%s3460_s28 + $0x90] sm:$0xff]  ;;  %v300_v59 = vld [vmem:[%s3460_s28 + $0xa0] sm:$0xff]  ;;  %v407_v60 = vmul.f32 %v3472_v56, %v332_v55  ;;  %v409_v1 = vmul.f32 %v3472_v56, %v334_v58 }
  0x1a   : > { %v304_v61 = vld [vmem:[%s3460_s28 + $0xc0] sm:$0xff]  ;;  %v373_v0 = vmul.f32 %v3472_v56, %v298_v57  ;;  %v302_v3 = vld [vmem:[%s3460_s28 + $0xb0] sm:$0xff]  ;;  %v375_v4 = vmul.f32 %v3472_v56, %v300_v59 }
  0x1b   : > { %982 = vperm.xlu1 %3216, %v744_v11   ;;  %972 = vperm.xlu0 %3215, %v742_v12   ;;  %v768_v62 = vld [vmem:[%s4280_s1 + $0x220] sm:$0xff]  ;;  %v379_v5 = vmul.f32 %v3472_v56, %v304_v61  ;;  %v377_v7 = vmul.f32 %v3472_v56, %v302_v3  ;;  %v318_v8 = vld [vmem:[%s3460_s28 + $0x130] sm:$0xff] }
  0x1c   : > { %v3485_v63 = vld [vmem:[%s4283_s4] ss:$0 sm:$0xff] }
  0x1d   : > { %v482_v6 = vadd.f32 %v3485_v63, %v407_v60  ;;  %v448_v9 = vadd.f32 %v3485_v63, %v373_v0  ;;  %v484_v10 = vadd.f32 %v3485_v63, %v409_v1  ;;  %v316_v11 = vld [vmem:[%s3460_s28 + $0x120] sm:$0xff]  ;;  %v450_v12 = vadd.f32 %v3485_v63, %v375_v4  ;;  %v310_v0 = vld [vmem:[%s3460_s28 + $0xf0] sm:$0xff] }
  0x1e   : > { %v338_v13 = vld [vmem:[%s3460_s28 + $0x1e0] sm:$0xff]  ;;  %v454_v14 = vadd.f32 %v3485_v63, %v379_v5 }
  0x1f   : > { %967 = vperm.xlu1 %3216, %v741_v15   ;;  %957 = vperm.xlu0 %3215, %v739_v16   ;;  %v393_v15 = vmul.f32 %v3472_v56, %v318_v8  ;;  %v336_v16 = vld [vmem:[%s3460_s28 + $0x1d0] sm:$0xff]  ;;  %vm550_vm0 = vcmp.ge.f32.partialorder %v482_v6, 0.0  ;;  %vm516_vm1 = vcmp.ge.f32.partialorder %v448_v9, 0.0  ;;  %vm552_vm2 = vcmp.ge.f32.partialorder %v484_v10, 0.0  ;;  %v312_v57 = vld [vmem:[%s3460_s28 + $0x100] sm:$0xff] }
  0x20   : > { %vm518_vm3 = vcmp.ge.f32.partialorder %v450_v12, 0.0  ;;  %vm522_vm4 = vcmp.ge.f32.partialorder %v454_v14, 0.0  ;;  %v387_v5 = vmul.f32 %v3472_v56, %v312_v57 }
  0x23   : > { %987 = vperm.xlu1 %3216, %v745_v17   ;;  %977 = vperm.xlu0 %3215, %v743_v18   ;;  %v322_v17 = vld [vmem:[%s3460_s28 + $0x150] sm:$0xff]  ;;  %v618_v18 = vmul.f32 0.01, %v482_v6 }
  0x27   : > { %912 = vperm.xlu1 %3216, %v730_v19   ;;  %902 = vperm.xlu0 %3215, %v728_v20   ;;  %v452_v19 = vadd.f32 %v3485_v63, %v377_v7  ;;  %v391_v20 = vmul.f32 %v3472_v56, %v316_v11 }
  0x29   : > { %vm520_vm5 = vcmp.ge.f32.partialorder %v452_v19, 0.0 }
  0x2b   : > { %932 = vperm.xlu1 %3216, %v734_v21   ;;  %922 = vperm.xlu0 %3215, %v732_v22   ;;  %v320_v21 = vld [vmem:[%s3460_s28 + $0x140] sm:$0xff]  ;;  %v584_v22 = vmul.f32 0.01, %v448_v9 }
  0x2f   : > { %1002 = vperm.xlu1 %3216, %v748_v24   ;;  %992 = vperm.xlu0 %3215, %v746_v25   ;;  %v620_v24 = vmul.f32 0.01, %v484_v10  ;;  %v413_v25 = vmul.f32 %v3472_v56, %v338_v13 }
  0x33   : > { %1022 = vperm.xlu1 %3216, %v752_v26   ;;  %1012 = vperm.xlu0 %3215, %v750_v27   ;;  %v586_v26 = vmul.f32 0.01, %v450_v12  ;;  %v411_v27 = vmul.f32 %v3472_v56, %v336_v16 }
  0x37   : > { %1007 = vperm.xlu1 %3216, %v749_v28   ;;  %997 = vperm.xlu0 %3215, %v747_v29   ;;  %v397_v28 = vmul.f32 %v3472_v56, %v322_v17  ;;  %v590_v29 = vmul.f32 0.01, %v454_v14 }
  0x3b   : > { %1027 = vperm.xlu1 %3216, %v753_v30   ;;  %1017 = vperm.xlu0 %3215, %v751_v31   ;;  %v468_v30 = vadd.f32 %v3485_v63, %v393_v15  ;;  %v395_v31 = vmul.f32 %v3472_v56, %v320_v21  ;;  %v324_v15 = vld [vmem:[%s3460_s28 + $0x160] sm:$0xff] }
  0x3d   : > { %vm536_vm6 = vcmp.ge.f32.partialorder %v468_v30, 0.0 }
  0x3f   : > { %782 = vperm.xlu1 %3216, %v704_v32   ;;  %772 = vperm.xlu0 %3215, %v702_v33   ;;  %v466_v32 = vadd.f32 %v3485_v63, %v391_v20  ;;  %v3514_v33 = vsel %vm550_vm0, %v482_v6, %v618_v18  ;;  %v326_v6 = vld [vmem:[%s3460_s28 + $0x170] sm:$0xff] }
  0x40   : > { %v330_v20 = vld [vmem:[%s3460_s28 + $0x190] sm:$0xff] }
  0x41   : > { %vm534_vm7 = vcmp.ge.f32.partialorder %v466_v32, 0.0 }
  0x43   : > { %802 = vperm.xlu1 %3216, %v708_v34   ;;  %792 = vperm.xlu0 %3215, %v706_v35   ;;  %v3516_v34 = vsel %vm516_vm1, %v448_v9, %v584_v22  ;;  %v3518_v35 = vsel %vm552_vm2, %v484_v10, %v620_v24  ;;  %vm1243_vm1 = vcmask 130048  }
  0x47   : > { %822 = vperm.xlu1 %3216, %v712_v37   ;;  %812 = vperm.xlu0 %3215, %v710_v38   ;;  %v488_v37 = vadd.f32 %v3485_v63, %v413_v25  ;;  %v319_v38 = vld [vmem:[%s3460_s28 + $0x138] sm:$0x1]  ;;  %v462_v25 = vadd.f32 %v3485_v63, %v387_v5 }
  0x49   : > { %vm556_vm8 = vcmp.ge.f32.partialorder %v488_v37, 0.0 }
  0x4b   : > { %787 = vperm.xlu1 %3216, %v705_v39   ;;  %777 = vperm.xlu0 %3215, %v703_v40   ;;  %v317_v39 = vld [vmem:[%s3460_s28 + $0x128] sm:$0x1]  ;;  %v3523_v40 = vsel %vm518_vm3, %v450_v12, %v586_v26  ;;  %v399_v26 = vmul.f32 %v3472_v56, %v324_v15  ;;  %vm530_vm3 = vcmp.ge.f32.partialorder %v462_v25, 0.0 }
  0x4f   : > { %842 = vperm.xlu1 %3216, %v716_v41   ;;  %832 = vperm.xlu0 %3215, %v714_v42   ;;  %v486_v41 = vadd.f32 %v3485_v63, %v411_v27  ;;  %v472_v42 = vadd.f32 %v3485_v63, %v397_v28 }
  0x51   : > { %vm554_vm9 = vcmp.ge.f32.partialorder %v486_v41, 0.0  ;;  %v622_v58 = vmul.f32 0.01, %v486_v41  ;;  %vm540_vm10 = vcmp.ge.f32.partialorder %v472_v42, 0.0  ;;  %v608_v60 = vmul.f32 0.01, %v472_v42 }
  0x53   : > { %807 = vperm.xlu1 %3216, %v709_v43   ;;  %797 = vperm.xlu0 %3215, %v707_v44   ;;  %v323_v43 = vld [vmem:[%s3460_s28 + $0x158] sm:$0x1]  ;;  %v3528_v44 = vsel %vm522_vm4, %v454_v14, %v590_v29  ;;  %v3560_v12 = vsel %vm554_vm9, %v486_v41, %v622_v58  ;;  %v385_v14 = vmul.f32 %v3472_v56, %v310_v0  ;;  %v282_v0 = vld [vmem:[%s3460_s28 + $0x10] sm:$0xff] }
  0x54   : > { %v398_v55 = vmul.f32 %v3472_v56, %v323_v43  ;;  %v3566_v16 = vsel %vm540_vm10, %v472_v42, %v608_v60  ;;  %v598_v43 = vmul.f32 0.01, %v462_v25 }
  0x55   : > { %v460_v29 = vadd.f32 %v3485_v63, %v385_v14 }
  0x56   : > { %v473_v10 = vadd.f32 %v3485_v63, %v398_v55 }
  0x57   : > { %827 = vperm.xlu1 %3216, %v713_v45   ;;  %817 = vperm.xlu0 %3215, %v711_v46   ;;  %v588_v45 = vmul.f32 0.01, %v452_v19  ;;  %v470_v46 = vadd.f32 %v3485_v63, %v395_v31  ;;  %v328_v31 = vld [vmem:[%s3460_s28 + $0x180] sm:$0xff]  ;;  %vm528_vm4 = vcmp.ge.f32.partialorder %v460_v29, 0.0 }
  0x58   : > { %vm541_vm14 = vcmp.ge.f32.partialorder %v473_v10, 0.0  ;;  %v609_v27 = vmul.f32 0.01, %v473_v10 }
  0x59   : > { %vm538_vm11 = vcmp.ge.f32.partialorder %v470_v46, 0.0  ;;  %v606_v61 = vmul.f32 0.01, %v470_v46  ;;  %v3547_v7 = vsel %vm520_vm5, %v452_v19, %v588_v45  ;;  %v401_v19 = vmul.f32 %v3472_v56, %v326_v6  ;;  %v325_v45 = vld [vmem:[%s3460_s28 + $0x168] sm:$0x1] }
  0x5a   : > { %v400_v58 = vmul.f32 %v3472_v56, %v325_v45 }
  0x5b   : > { %847 = vperm.xlu1 %3216, %v717_v47   ;;  %837 = vperm.xlu0 %3215, %v715_v48   ;;  %v321_v47 = vld [vmem:[%s3460_s28 + $0x148] sm:$0x1]  ;;  %v604_v48 = vmul.f32 0.01, %v468_v30  ;;  %v3569_v17 = vsel %vm538_vm11, %v470_v46, %v606_v61  ;;  %v474_v46 = vadd.f32 %v3485_v63, %v399_v26  ;;  %v3606_v61 = vsel %vm530_vm3, %v462_v25, %v598_v43 }
  0x5c   : > { %v396_v59 = vmul.f32 %v3472_v56, %v321_v47  ;;  %v403_v47 = vmul.f32 %v3472_v56, %v328_v31 }
  0x5d   : > { %v3550_v8 = vsel %vm536_vm6, %v468_v30, %v604_v48  ;;  %v405_v30 = vmul.f32 %v3472_v56, %v330_v20  ;;  %v3590_v48 = vsel %vm541_vm14, %v473_v10, %v609_v27  ;;  %vm542_vm6 = vcmp.ge.f32.partialorder %v474_v46, 0.0  ;;  %v286_v27 = vld [vmem:[%s3460_s28 + $0x30] sm:$0xff] }
  0x5e   : > { %v471_v13 = vadd.f32 %v3485_v63, %v396_v59 }
  0x5f   : > { %942 = vperm.xlu1 %3216, %v736_v49   ;;  %852 = vperm.xlu0 %3215, %v718_v50   ;;  %v394_v49 = vmul.f32 %v3472_v56, %v319_v38  ;;  %v392_v50 = vmul.f32 %v3472_v56, %v317_v39  ;;  %v327_v38 = vld [vmem:[%s3460_s28 + $0x178] sm:$0x1] }
  0x60   : > { %v607_v28 = vmul.f32 0.01, %v471_v13  ;;  %vm539_vm15 = vcmp.ge.f32.partialorder %v471_v13, 0.0 }
  0x61   : > { %v469_v1 = vadd.f32 %v3485_v63, %v394_v49  ;;  %v467_v3 = vadd.f32 %v3485_v63, %v392_v50  ;;  %v596_v49 = vmul.f32 0.01, %v460_v29  ;;  %v480_v50 = vadd.f32 %v3485_v63, %v405_v30 }
  0x62   : > { %v3596_v55 = vsel %vm539_vm15, %v471_v13, %v607_v28  ;;  %v280_v13 = vld [vmem:[%s3460_s28] sm:$0xff] }
  0x63   : > { %1072 = vperm.xlu1 %3216, %v762_v51   ;;  %857 = vperm.xlu0 %3215, %v719_v52   ;;  %v308_v51 = vld [vmem:[%s3460_s28 + $0xe0] sm:$0xff]  ;;  %v306_v52 = vld [vmem:[%s3460_s28 + $0xd0] sm:$0xff]  ;;  %v605_v21 = vmul.f32 0.01, %v469_v1  ;;  %v603_v22 = vmul.f32 0.01, %v467_v3  ;;  %v3612_v5 = vsel %vm528_vm4, %v460_v29, %v596_v49  ;;  %v355_v30 = vmul.f32 %v3472_v56, %v280_v13 }
  0x64   : > { %v381_v4 = vmul.f32 %v3472_v56, %v306_v52  ;;  %vm537_vm12 = vcmp.ge.f32.partialorder %v469_v1, 0.0  ;;  %vm535_vm13 = vcmp.ge.f32.partialorder %v467_v3, 0.0  ;;  %v331_v52 = vld [vmem:[%s3460_s28 + $0x198] sm:$0x1]  ;;  %v616_v6 = vmul.f32 0.01, %v480_v50 }
  0x65   : > { %v3582_v39 = vsel %vm537_vm12, %v469_v1, %v605_v21  ;;  %v3584_v41 = vsel %vm535_vm13, %v467_v3, %v603_v22  ;;  %v610_v1 = vmul.f32 0.01, %v474_v46  ;;  %v478_v3 = vadd.f32 %v3485_v63, %v403_v47  ;;  %v284_v49 = vld [vmem:[%s3460_s28 + $0x20] sm:$0xff] }
  0x66   : > { %v456_v24 = vadd.f32 %v3485_v63, %v381_v4  ;;  %v406_v4 = vmul.f32 %v3472_v56, %v331_v52  ;;  %v357_v21 = vmul.f32 %v3472_v56, %v282_v0 }
  0x67   : > { %1092 = vperm.xlu1 %3216, %v766_v53   ;;  %1082 = vperm.xlu0 %3215, %v764_v54   ;;  %v602_v53 = vmul.f32 0.01, %v466_v32  ;;  %v624_v54 = vmul.f32 0.01, %v488_v37  ;;  %v614_v28 = vmul.f32 0.01, %v478_v3 }
  0x68   : > { %v592_v42 = vmul.f32 0.01, %v456_v24  ;;  %vm524_vm2 = vcmp.ge.f32.partialorder %v456_v24, 0.0  ;;  %v481_v29 = vadd.f32 %v3485_v63, %v406_v4  ;;  %v432_v47 = vadd.f32 %v3485_v63, %v357_v21  ;;  %v288_v4 = vld [vmem:[%s3460_s28 + $0x40] sm:$0xff] }
  0x69   : > { %v3553_v9 = vsel %vm534_vm7, %v466_v32, %v602_v53  ;;  %v3557_v11 = vsel %vm556_vm8, %v488_v37, %v624_v54  ;;  %v476_v37 = vadd.f32 %v3485_v63, %v401_v19  ;;  %vm548_vm7 = vcmp.ge.f32.partialorder %v480_v50, 0.0 }
  0x6a   : > { %v3603_v60 = vsel %vm524_vm2, %v456_v24, %v592_v42  ;;  %v475_v19 = vadd.f32 %v3485_v63, %v400_v58  ;;  %vm546_vm8 = vcmp.ge.f32.partialorder %v478_v3, 0.0  ;;  %v361_v42 = vmul.f32 %v3472_v56, %v286_v27 }
  0x6b   : > { %1102 = vperm.xlu0 %3215, %v768_v62   ;;  %v383_v62 = vmul.f32 %v3472_v56, %v308_v51  ;;  %v402_v51 = vmul.f32 %v3472_v56, %v327_v38  ;;  %v612_v57 = vmul.f32 0.01, %v476_v37  ;;  %vm544_vm5 = vcmp.ge.f32.partialorder %v476_v37, 0.0 }
  0x6c   : > { %vm543_vm10 = vcmp.ge.f32.partialorder %v475_v19, 0.0  ;;  %vm549_vm11 = vcmp.ge.f32.partialorder %v481_v29, 0.0  ;;  %vm500_vm13 = vcmp.ge.f32.partialorder %v432_v47, 0.0  ;;  %vm1449_vm2 = vsmask.f32 7440 }
  0x6d   : > { %v458_v18 = vadd.f32 %v3485_v63, %v383_v62  ;;  %v329_v62 = vld [vmem:[%s3460_s28 + $0x188] sm:$0x1]  ;;  %v477_v10 = vadd.f32 %v3485_v63, %v402_v51  ;;  %v617_v51 = vmul.f32 0.01, %v481_v29 }
  0x6e   : > { %v404_v20 = vmul.f32 %v3472_v56, %v329_v62 }
  0x6f   : > { %vm526_vm0 = vcmp.ge.f32.partialorder %v458_v18, 0.0  ;;  %v594_v32 = vmul.f32 0.01, %v458_v18  ;;  %vm545_vm9 = vcmp.ge.f32.partialorder %v477_v10, 0.0 }
  0x70   : > { %v479_v38 = vadd.f32 %v3485_v63, %v404_v20  ;;  %v3681_v20 = vsel %vm549_vm11, %v481_v29, %v617_v51 }
  0x71   : > { %v3600_v59 = vsel %vm526_vm0, %v458_v18, %v594_v32  ;;  %v3616_v18 = vsel %vm544_vm5, %v476_v37, %v612_v57  ;;  %v3664_v57 = vld [vmem:[%s4281_s2 + $0x10] sm:$0xff]   ;;  %vm1448_vm0 = vsmask.f32 3328 }
  0x72   : > { %vm547_vm12 = vcmp.ge.f32.partialorder %v479_v38, 0.0  ;;  %v615_v0 = vmul.f32 0.01, %v479_v38 }
  0x86   : > { %v1033_v53 = vpop.permute.xlu1 %1032  ;;  %v863_v54 = vpop.permute.xlu0 %862 }
  0x87   : > { %v1162_v22 = vmul.f32 %v1033_v53, %v3514_v33  ;;  %v1128_v24 = vmul.f32 %v863_v54, %v3516_v34  ;;  %v3632_v33 = vsel %vm542_vm6, %v474_v46, %v610_v1  ;;  %v613_v34 = vmul.f32 0.01, %v477_v10  ;;  %v290_v54 = vld [vmem:[%s3460_s28 + $0x50] sm:$0xff]  ;;  %vm3769_vm6 = vmor %vm1448_vm0, %vm1449_vm2 }
  0x88   : > { %v611_v46 = vmul.f32 0.01, %v475_v19  ;;  %v436_v1 = vadd.f32 %v3485_v63, %v361_v42 }
  0x89   : > { %v3658_v53 = vsel %vm545_vm9, %v477_v10, %v613_v34  ;;  %v281_v34 = vld [vmem:[%s3460_s28 + $0x8] sm:$0x1] }
  0x8a   : > { %v1043_v14 = vpop.permute.xlu1 %1042  ;;  %v873_v15 = vpop.permute.xlu0 %872  ;;  %v3677_v13 = vsel %vm543_vm10, %v475_v19, %v611_v46  ;;  %vm504_vm15 = vcmp.ge.f32.partialorder %v436_v1, 0.0 }
  0x8b   : > { %v1164_v25 = vmul.f32 %v1043_v14, %v3518_v35  ;;  %v3625_v26 = vmul.f32 %v873_v15, %v3523_v40  ;;  %v3635_v40 = vsel %vm548_vm7, %v480_v50, %v616_v6  ;;  %v3650_v50 = vsel %vm546_vm8, %v478_v3, %v614_v28  ;;  %v283_v15 = vld [vmem:[%s3460_s28 + $0x18] sm:$0x1] }
  0x8c   : > { %v359_v3 = vmul.f32 %v3472_v56, %v284_v49  ;;  %v568_v14 = vmul.f32 0.01, %v432_v47  ;;  %v358_v28 = vmul.f32 %v3472_v56, %v283_v15 }
  0x8d   : > { %v2937_v31 = vpack.c.bf16 %v3625_v26, %v1128_v24  ;;  %v2965_v32 = vpack.c.bf16 %v1164_v25, %v1162_v22  ;;  %v363_v24 = vmul.f32 %v3472_v56, %v288_v4 }
  0x8e   : > { %v893_v37 = vpop.permute.xlu1 %892  ;;  %v883_v35 = vpop.permute.xlu0 %882  ;;  %v3702_v49 = vsel %vm500_vm13, %v432_v47, %v568_v14  ;;  %v3720_v47 = vld [vmem:[%s4281_s2 + $0x30] sm:$0xff]  }
  0x8f   : > { %v3640_v43 = vmul.f32 %v893_v37, %v3528_v44  ;;  %v3643_v45 = vmul.f32 %v883_v35, %v3547_v7  ;;  %3050 = vmatprep.mubr.msk.bf16.mxu1 %vm1243_vm1, %v2937_v31  ;;  %3090 = vmatprep.mubr.msk.bf16.mxu0 %vm1243_vm1, %v2965_v32  ;;  %v430_v44 = vadd.f32 %v3485_v63, %v355_v30  ;;  %v572_v32 = vmul.f32 0.01, %v436_v1 }
  0x90   : > { %v3696_v31 = vsel %vm547_vm12, %v479_v38, %v615_v0  ;;  %v3711_v38 = vadd.f32 %v3485_v63, %v363_v24  ;;  %v356_v0 = vmul.f32 %v3472_v56, %v281_v34 }
  0x91   : > { %v2938_v7 = vpack.c.bf16 %v3640_v43, %v3643_v45  ;;  %v566_v21 = vmul.f32 0.01, %v430_v44  ;;  %vm498_vm14 = vcmp.ge.f32.partialorder %v430_v44, 0.0  ;;  %v3729_v4 = vsel %vm504_vm15, %v436_v1, %v572_v32 }
  0x92   : > { %v963_v58 = vpop.permute.xlu1 %962  ;;  %v953_v62 = vpop.permute.xlu0 %952  ;;  %v3741_v1 = vmul.f32 0.01, %v3711_v38  ;;  %vm506_vm5 = vcmp.ge.f32.partialorder %v3711_v38, 0.0 }
  0x93   : > { %v3670_v6 = vmul.f32 %v963_v58, %v3550_v8  ;;  %v3673_v10 = vmul.f32 %v953_v62, %v3553_v9  ;;  %3051 = vmatmul.mubr.msk.bf16.vlgmr.msra.gmra.mrb[0].mxu1 %vm1243_vm1, %v2938_v7  ;;  %v365_v8 = vmul.f32 %v3472_v56, %v290_v54  ;;  %v3705_v51 = vsel %vm498_vm14, %v430_v44, %v566_v21 }
  0x94   : > { %3059 = vmatpush3.bf16.msra.mxu1 %v3399_v36  ;;  %v434_v36 = vadd.f32 %v3485_v63, %v359_v3 }
  0x95   : > { %v2971_v9 = vpack.c.bf16 %v3670_v6, %v3670_v6  ;;  %v2969_v19 = vpack.c.bf16 %v3673_v10, %v3673_v10  ;;  %3068 = vmatprep.subr.bf16.mxu1 %v3664_v57  ;;  %v3708_v7 = vadd.f32 %v3485_v63, %v365_v8 }
  0x96   : > { %v1063_v25 = vpop.permute.xlu1 %1062  ;;  %v1053_v27 = vpop.permute.xlu0 %1052  ;;  %vm502_vm3 = vcmp.ge.f32.partialorder %v434_v36, 0.0 }
  0x97   : > { %v1936_v29 = vshrl.u32 %v2971_v9, 16  ;;  %v1939_v30 = vshll.u32 %v2971_v9, 16  ;;  %v1922_v37 = vshrl.u32 %v2969_v19, 16  ;;  %v1925_v35 = vshll.u32 %v2969_v19, 16 }
  0x98   : > { %v1168_v42 = vmul.f32 %v1063_v25, %v3557_v11  ;;  %v1166_v46 = vmul.f32 %v1053_v27, %v3560_v12  ;;  %v570_v11 = vmul.f32 0.01, %v434_v36  ;;  %v3714_v12 = vadd.f32 %v3485_v63, %v358_v28 }
  0x99   : > { %v1938_v14 = vrot.slane %v1936_v29, 4  ;;  %v1941_v15 = vrot.slane %v1939_v30, 5  ;;  %v1924_v21 = vrot.slane %v1922_v37, 4  ;;  %v1927_v8 = vrot.slane %v1925_v35, 5  ;;  %v294_v37 = vld [vmem:[%s3460_s28 + $0x70] sm:$0xff] }
  0x9a   : > { %v2966_v54 = vpack.c.bf16 %v1168_v42, %v1166_v46  ;;  %v983_v58 = vpop.permute.xlu1 %982  ;;  %v973_v62 = vpop.permute.xlu0 %972  ;;  %v3745_v27 = vsel %vm502_vm3, %v434_v36, %v570_v11  ;;  %v3748_v28 = vmul.f32 0.01, %v3714_v12  ;;  %v3751_v29 = vadd.f32 %v3485_v63, %v356_v0 }
  0x9b   : > { %v3723_v44 = vmul.f32 %v983_v58, %v3566_v16  ;;  %v3726_v3 = vmul.f32 %v973_v62, %v3569_v17  ;;  %v3738_v17 = vmul.f32 0.01, %v3708_v7  ;;  %v1942_v35 = vor.u32 %v1941_v15, %v1938_v14 }
  0x9c   : > { %3091 = vmatmul.mubr.msk.bf16.vlgmr.msra.gmra.mrb[0].mxu0 %vm1243_vm1, %v2966_v54  ;;  %v1928_v42 = vor.u32 %v1927_v8, %v1924_v21  ;;  %v292_v54 = vld [vmem:[%s3460_s28 + $0x60] sm:$0xff]  ;;  %vm508_vm4 = vcmp.ge.f32.partialorder %v3708_v7, 0.0  ;;  %v287_v8 = vld [vmem:[%s3460_s28 + $0x38] sm:$0x1]  ;;  %vm501_vm7 = vcmp.ge.f32.partialorder %v3714_v12, 0.0  ;;  %vm499_vm8 = vcmp.ge.f32.partialorder %v3751_v29, 0.0 }
  0x9d   : > { %v2975_v9 = vpack.c.bf16 %v3723_v44, %v3723_v44  ;;  %3099 = vmatpush3.bf16.msra.mxu0 %v3357_v23  ;;  %v2973_v19 = vpack.c.bf16 %v3726_v3, %v3726_v3  ;;  %v367_v21 = vmul.f32 %v3472_v56, %v292_v54  ;;  %v362_v54 = vmul.f32 %v3472_v56, %v287_v8 }
  0x9e   : > { %v968_v24 = vpop.permute.xlu1 %967  ;;  %v958_v25 = vpop.permute.xlu0 %957  ;;  %3108 = vmatprep.subr.bf16.mxu0 %v3720_v47 }
  0x9f   : > { %v1964_v23 = vshrl.u32 %v2975_v9, 16  ;;  %v1967_v30 = vshll.u32 %v2975_v9, 16  ;;  %v1149_v32 = vmul.f32 %v968_v24, %v3582_v39  ;;  %v1147_v34 = vmul.f32 %v958_v25, %v3584_v41 }
  0xa0   : > { %v1950_v46 = vshrl.u32 %v2973_v19, 16  ;;  %v1953_v36 = vshll.u32 %v2973_v19, 16  ;;  %v3759_v9 = vmul.f32 0.01, %v3751_v29  ;;  %v369_v39 = vmul.f32 %v3472_v56, %v294_v37 }
  0xa1   : > { %v1966_v58 = vrot.slane %v1964_v23, 4  ;;  %v1969_v62 = vrot.slane %v1967_v30, 5  ;;  %v2972_v11 = vpack.c.bf16 %v1149_v32, %v1149_v32  ;;  %v2970_v0 = vpack.c.bf16 %v1147_v34, %v1147_v34  ;;  %v285_v34 = vld [vmem:[%s3460_s28 + $0x28] sm:$0x1] }
  0xa2   : > { %v1952_v2 = vrot.slane %v1950_v46, 4  ;;  %v1955_v16 = vrot.slane %v1953_v36, 5  ;;  %v988_v22 = vpop.permute.xlu1 %987  ;;  %v978_v52 = vpop.permute.xlu0 %977  ;;  %v1943_v19 = vrot.slane %v1942_v35, 4  ;;  %v1929_v24 = vrot.slane %v1928_v42, 4 }
  0xa3   : > { %v1945_v41 = vshll.u32 %v2972_v11, 16  ;;  %v1931_v14 = vshll.u32 %v2970_v0, 16  ;;  %v1153_v15 = vmul.f32 %v988_v22, %v3590_v48  ;;  %v1151_v23 = vmul.f32 %v978_v52, %v3596_v55  ;;  %v291_v11 = vld [vmem:[%s3460_s28 + $0x58] sm:$0x1]  ;;  %v289_v0 = vld [vmem:[%s3460_s28 + $0x48] sm:$0x1] }
  0xa4   : > { %v1970_v48 = vor.u32 %v1969_v62, %v1966_v58  ;;  %v1956_v37 = vor.u32 %v1955_v16, %v1952_v2  ;;  %v444_v36 = vadd.f32 %v3485_v63, %v369_v39  ;;  %v360_v39 = vmul.f32 %v3472_v56, %v285_v34 }
  0xa5   : > { %v1947_v22 = vrot.slane %v1945_v41, 5  ;;  %v1933_v30 = vrot.slane %v1931_v14, 5  ;;  %v2976_v32 = vpack.c.bf16 %v1153_v15, %v1153_v15  ;;  %v2974_v35 = vpack.c.bf16 %v1151_v23, %v1151_v23 }
  0xa6   : > { %v913_v46 = vpop.permute.xlu1 %912  ;;  %v903_v42 = vpop.permute.xlu0 %902  ;;  %v1971_v14 = vrot.slane %v1970_v48, 4  ;;  %v366_v8 = vmul.f32 %v3472_v56, %v291_v11  ;;  %v1957_v23 = vrot.slane %v1956_v37, 4  ;;  %vm512_vm9 = vcmp.ge.f32.partialorder %v444_v36, 0.0 }
  0xa7   : > { %v1948_v55 = vsel %vm3769_vm6, %v1943_v19, %v1947_v22  ;;  %v1934_v52 = vsel %vm3769_vm6, %v1929_v24, %v1933_v30  ;;  %v1973_v58 = vshll.u32 %v2976_v32, 16  ;;  %v3785_v62 = vmul.f32 %v913_v46, %v3600_v59 }
  0xa8   : > { %v1959_v2 = vshll.u32 %v2974_v35, 16  ;;  %v3788_v16 = vmul.f32 %v903_v42, %v3603_v60  ;;  %v2849_v41 = vcombine.low %v1934_v52, %v1948_v55  ;;  %v364_v19 = vmul.f32 %v3472_v56, %v289_v0  ;;  %v3818_v0 = vld [vmem:[%s4281_s2 + $0x38] sm:$0xff]  }
  0xa9   : > { %v1975_v15 = vrot.slane %v1973_v58, 5  ;;  %v580_v35 = vmul.f32 0.01, %v444_v36  ;;  %v442_v46 = vadd.f32 %v3485_v63, %v367_v21  ;;  %v3824_v21 = vsel %vm508_vm4, %v3708_v7, %v3738_v17 }
  0xaa   : > { %v1961_v22 = vrot.slane %v1959_v2, 5  ;;  %v2939_v24 = vpack.c.bf16 %v3785_v62, %v3788_v16  ;;  %v933_v30 = vpop.permute.xlu1 %932  ;;  %v923_v60 = vpop.permute.xlu0 %922  ;;  %3100 = vmatprep.mubr.msk.bf16.mxu0 %vm1243_vm1, %v2849_v41  ;;  %v441_v58 = vadd.f32 %v3485_v63, %v366_v8  ;;  %v439_v2 = vadd.f32 %v3485_v63, %v364_v19 }
  0xab   : > { %v1976_v48 = vsel %vm3769_vm6, %v1971_v14, %v1975_v15  ;;  %v3801_v32 = vmul.f32 %v933_v30, %v3606_v61  ;;  %v3804_v34 = vmul.f32 %v923_v60, %v3612_v5  ;;  %v437_v61 = vadd.f32 %v3485_v63, %v362_v54  ;;  %v295_v14 = vld [vmem:[%s3460_s28 + $0x78] sm:$0x1] }
  0xac   : > { %v1962_v37 = vsel %vm3769_vm6, %v1957_v23, %v1961_v22  ;;  %3054 = vmatprep.mubr.msk.bf16.mxu1 %vm1243_vm1, %v2939_v24  ;;  %v435_v5 = vadd.f32 %v3485_v63, %v360_v39  ;;  %v3830_v54 = vsel %vm506_vm5, %v3711_v38, %v3741_v1  ;;  %v3846_v7 = vsel %vm501_vm7, %v3714_v12, %v3748_v28 }
  0xad   : > { %v2850_v42 = vcombine.low %v1962_v37, %v1976_v48  ;;  %v2940_v11 = vpack.c.bf16 %v3801_v32, %v3804_v34  ;;  %v3852_v38 = vsel %vm499_vm8, %v3751_v29, %v3759_v9  ;;  %vm510_vm10 = vcmp.ge.f32.partialorder %v442_v46, 0.0 }
  0xae   : > { %v1003_v55 = vpop.permute.xlu1 %1002  ;;  %v993_v52 = vpop.permute.xlu0 %992  ;;  %v573_v1 = vmul.f32 0.01, %v437_v61  ;;  %v571_v28 = vmul.f32 0.01, %v435_v5  ;;  %vm505_vm11 = vcmp.ge.f32.partialorder %v437_v61, 0.0  ;;  %vm503_vm12 = vcmp.ge.f32.partialorder %v435_v5, 0.0 }
  0xaf   : > { %v3835_v41 = vmul.f32 %v1003_v55, %v3616_v18  ;;  %v3838_v39 = vmul.f32 %v993_v52, %v3632_v33  ;;  %3101 = vmatmul.mubr.msk.bf16.vlgmr.msra.gmra.mrb[0].mxu0 %vm1243_vm1, %v2850_v42  ;;  %3055 = vmatmul.mubr.msk.bf16.gmra.mrb[4].mxu1 %vm1243_vm1, %v2940_v11  ;;  %v3856_v18 = vsel %vm512_vm9, %v444_v36, %v580_v35  ;;  %v578_v33 = vmul.f32 0.01, %v442_v46  ;;  %v293_v42 = vld [vmem:[%s3460_s28 + $0x68] sm:$0x1] }
  0xb0   : > { %3109 = vmatpush3.bf16.msra.mxu0 %v3720_v47  ;;  %v577_v47 = vmul.f32 0.01, %v441_v58  ;;  %v575_v36 = vmul.f32 0.01, %v439_v2  ;;  %vm509_vm13 = vcmp.ge.f32.partialorder %v441_v58, 0.0  ;;  %v370_v30 = vmul.f32 %v3472_v56, %v295_v14 }
  0xb1   : > { %v2979_v17 = vpack.c.bf16 %v3835_v41, %v3835_v41  ;;  %v2977_v12 = vpack.c.bf16 %v3838_v39, %v3838_v39  ;;  %3118 = vmatprep.subr.bf16.mxu0 %v3818_v0  ;;  %vm507_vm14 = vcmp.ge.f32.partialorder %v439_v2, 0.0  ;;  %v3882_v14 = vsel %vm505_vm11, %v437_v61, %v573_v1 }
  0xb2   : > { %v1023_v29 = vpop.permute.xlu1 %1022  ;;  %v1013_v9 = vpop.permute.xlu0 %1012  ;;  %v4295_v25 = vmov 0  }
  0xb3   : > { %v1992_v15 = vshrl.u32 %v2979_v17, 16  ;;  %v1995_v8 = vshll.u32 %v2979_v17, 16  ;;  %v1978_v19 = vshrl.u32 %v2977_v12, 16  ;;  %v1981_v23 = vshll.u32 %v2977_v12, 16 }
  0xb4   : > { %v3865_v22 = vmul.f32 %v1023_v29, %v3635_v40  ;;  %v3868_v24 = vmul.f32 %v1013_v9, %v3650_v50  ;;  %v3877_v50 = vsel %vm510_vm10, %v442_v46, %v578_v33  ;;  %v3885_v29 = vsel %vm503_vm12, %v435_v5, %v571_v28 }
  0xb5   : > { %v1994_v60 = vrot.slane %v1992_v15, 4  ;;  %v1997_v48 = vrot.slane %v1995_v8, 5  ;;  %v1980_v37 = vrot.slane %v1978_v19, 4  ;;  %v1983_v35 = vrot.slane %v1981_v23, 5 }
  0xb6   : > { %v2983_v11 = vpack.c.bf16 %v3865_v22, %v3865_v22  ;;  %v2981_v55 = vpack.c.bf16 %v3868_v24, %v3868_v24  ;;  %v1008_v52 = vpop.permute.xlu1 %1007  ;;  %v998_v40 = vpop.permute.xlu0 %997  ;;  %v3888_v8 = vsel %vm509_vm13, %v441_v58, %v577_v47  ;;  %v368_v19 = vmul.f32 %v3472_v56, %v293_v42 }
  0xb7   : > { %v1157_v17 = vmul.f32 %v1008_v52, %v3658_v53  ;;  %v1155_v12 = vmul.f32 %v998_v40, %v3677_v13  ;;  %v1998_v9 = vor.u32 %v1997_v48, %v1994_v60  ;;  %v1984_v15 = vor.u32 %v1983_v35, %v1980_v37  ;;  %v296_v13 = vld [vmem:[%s3460_s28 + $0x80] sm:$0xff] }
  0xb8   : > { %v3891_v23 = vsel %vm507_vm14, %v439_v2, %v575_v36  ;;  %v3894_v53 = vadd.f32 %v3485_v63, %v370_v30  ;;  %v2020_v61 = vshrl.u32 %v2983_v11, 16  ;;  %v2023_v1 = vshll.u32 %v2983_v11, 16 }
  0xb9   : > { %v2980_v46 = vpack.c.bf16 %v1157_v17, %v1157_v17  ;;  %v2978_v33 = vpack.c.bf16 %v1155_v12, %v1155_v12  ;;  %v2006_v52 = vshrl.u32 %v2981_v55, 16  ;;  %v2009_v5 = vshll.u32 %v2981_v55, 16 }
  0xba   : > { %v1028_v28 = vpop.permute.xlu1 %1027  ;;  %v1018_v60 = vpop.permute.xlu0 %1017  ;;  %v1999_v35 = vrot.slane %v1998_v9, 4  ;;  %v1985_v42 = vrot.slane %v1984_v15, 4  ;;  %v3900_v2 = vadd.f32 %v3485_v63, %v368_v19  ;;  %v371_v36 = vmul.f32 %v3472_v56, %v296_v13 }
  0xbb   : > { %v2001_v48 = vshll.u32 %v2980_v46, 16  ;;  %v1987_v37 = vshll.u32 %v2978_v33, 16  ;;  %v1161_v58 = vmul.f32 %v1028_v28, %v3681_v20  ;;  %v1159_v47 = vmul.f32 %v1018_v60, %v3696_v31 }
  0xbc   : > { %v2022_v55 = vrot.slane %v2020_v61, 4  ;;  %v2025_v12 = vrot.slane %v2023_v1, 5  ;;  %v2008_v59 = vrot.slane %v2006_v52, 4  ;;  %vm513_vm15 = vcmp.ge.f32.partialorder %v3894_v53, 0.0 }
  0xbd   : > { %v2003_v30 = vrot.slane %v2001_v48, 5  ;;  %v1989_v40 = vrot.slane %v1987_v37, 5  ;;  %v2984_v11 = vpack.c.bf16 %v1161_v58, %v1161_v58  ;;  %v2982_v17 = vpack.c.bf16 %v1159_v47, %v1159_v47 }
  0xbe   : > { %v783_v46 = vpop.permute.xlu1 %782  ;;  %v773_v33 = vpop.permute.xlu0 %772  ;;  %v2011_v20 = vrot.slane %v2009_v5, 5  ;;  %v581_v61 = vmul.f32 0.01, %v3894_v53  ;;  %vm511_vm0 = vcmp.ge.f32.partialorder %v3900_v2, 0.0  ;;  %v579_v52 = vmul.f32 0.01, %v3900_v2 }
  0xbf   : > { %v2004_v31 = vsel %vm3769_vm6, %v1999_v35, %v2003_v30  ;;  %v1990_v9 = vsel %vm3769_vm6, %v1985_v42, %v1989_v40  ;;  %v2029_v15 = vshll.u32 %v2984_v11, 16  ;;  %v3909_v56 = vmul.f32 %v783_v46, %v3702_v49 }
  0xc0   : > { %v1110_v19 = vmul.f32 %v773_v33, %v3705_v51  ;;  %v2851_v13 = vcombine.low %v1990_v9, %v2004_v31  ;;  %v2015_v1 = vshll.u32 %v2982_v17, 16  ;;  %v446_v5 = vadd.f32 %v3485_v63, %v371_v36 }
  0xc1   : > { %v2026_v28 = vor.u32 %v2025_v12, %v2022_v55  ;;  %v2947_v60 = vpack.c.bf16 %v3909_v56, %v3909_v56  ;;  %v2012_v51 = vor.u32 %v2011_v20, %v2008_v59  ;;  %v2031_v47 = vrot.slane %v2029_v15, 5 }
  0xc2   : > { %v2941_v48 = vpack.c.bf16 %v3909_v56, %v1110_v19  ;;  %v2945_v49 = vpack.c.bf16 %v1110_v19, %v1110_v19  ;;  %v803_v37 = vpop.permute.xlu1 %802  ;;  %v793_v58 = vpop.permute.xlu0 %792  ;;  %3104 = vmatprep.mubr.msk.bf16.mxu0 %vm1243_vm1, %v2851_v13  ;;  %v2017_v11 = vrot.slane %v2015_v1, 5  ;;  %v3936_v20 = vsel %vm513_vm15, %v3894_v53, %v581_v61 }
  0xc3   : > { %v3921_v35 = vmul.f32 %v803_v37, %v3729_v4  ;;  %v1114_v42 = vmul.f32 %v793_v58, %v3745_v27  ;;  %v1466_v30 = vshrl.u32 %v2947_v60, 16  ;;  %v1469_v63 = vshll.u32 %v2947_v60, 16  ;;  %v3931_v4 = vld [vmem:[%s4281_s2 + $0x18] sm:$0xff]  }
  0xc4   : > { %v1452_v36 = vshrl.u32 %v2945_v49, 16  ;;  %v1455_v40 = vshll.u32 %v2945_v49, 16  ;;  %3060 = vmatprep.mubr.msk.bf16.mxu1 %vm1243_vm1, %v2941_v48  ;;  %vm514_vm2 = vcmp.ge.f32.partialorder %v446_v5, 0.0  ;;  %v2027_v31 = vrot.slane %v2026_v28, 4 }
  0xc5   : > { %v2951_v17 = vpack.c.bf16 %v3921_v35, %v3921_v35  ;;  %v2942_v55 = vpack.c.bf16 %v3921_v35, %v1114_v42  ;;  %v2949_v12 = vpack.c.bf16 %v1114_v42, %v1114_v42  ;;  %v1468_v59 = vrot.slane %v1466_v30, 4 }
  0xc6   : > { %v1471_v27 = vrot.slane %v1469_v63, 5  ;;  %v823_v46 = vpop.permute.xlu1 %822  ;;  %v813_v33 = vpop.permute.xlu0 %812  ;;  %v2013_v9 = vrot.slane %v2012_v51, 4  ;;  %v1454_v15 = vrot.slane %v1452_v36, 4  ;;  %v1457_v19 = vrot.slane %v1455_v40, 5 }
  0xc7   : > { %3061 = vmatmul.mubr.msk.bf16.vlgmr.msra.gmra.mrb[0].mxu1 %vm1243_vm1, %v2942_v55  ;;  %v1494_v13 = vshrl.u32 %v2951_v17, 16  ;;  %v1497_v1 = vshll.u32 %v2951_v17, 16  ;;  %v3940_v60 = vmul.f32 %v823_v46, %v3824_v21  ;;  %v3943_v48 = vmul.f32 %v813_v33, %v3830_v54 }
  0xc8   : > { %3069 = vmatpush3.bf16.msra.mxu1 %v3664_v57  ;;  %v2032_v53 = vsel %vm3769_vm6, %v2027_v31, %v2031_v47  ;;  %v2018_v61 = vsel %vm3769_vm6, %v2013_v9, %v2017_v11  ;;  %v1480_v28 = vshrl.u32 %v2949_v12, 16  ;;  %v582_v49 = vmul.f32 0.01, %v446_v5 }
  0xc9   : > { %3078 = vmatprep.subr.bf16.mxu1 %v3931_v4  ;;  %v1472_v37 = vor.u32 %v1471_v27, %v1468_v59  ;;  %v1483_v58 = vshll.u32 %v2949_v12, 16  ;;  %v2955_v21 = vpack.c.bf16 %v3940_v60, %v3940_v60  ;;  %v2943_v54 = vpack.c.bf16 %v3940_v60, %v3943_v48 }
  0xca   : > { %v788_v51 = vpop.permute.xlu1 %787  ;;  %v778_v57 = vpop.permute.xlu0 %777  ;;  %v1458_v30 = vor.u32 %v1457_v19, %v1454_v15  ;;  %v2985_v47 = vpack.c.bf16 %v1114_v42, %v3909_v56  ;;  %v2953_v63 = vpack.c.bf16 %v3943_v48, %v3943_v48  ;;  %v3961_v36 = vsel %vm511_vm0, %v3900_v2, %v579_v52 }
  0xcb   : > { %v1496_v40 = vrot.slane %v1494_v13, 4  ;;  %v1499_v11 = vrot.slane %v1497_v1, 5  ;;  %v2852_v17 = vcombine.low %v2018_v61, %v2032_v53  ;;  %v1113_v55 = vmul.f32 %v788_v51, %v3846_v7  ;;  %3064 = vmatprep.mubr.msk.bf16.mxu1 %vm1243_vm1, %v2943_v54 }
  0xcc   : > { %v1482_v12 = vrot.slane %v1480_v28, 4  ;;  %v1522_v59 = vshrl.u32 %v2955_v21, 16  ;;  %v1525_v27 = vshll.u32 %v2955_v21, 16  ;;  %v3966_v56 = vsel %vm514_vm2, %v446_v5, %v582_v49 }
  0xcd   : > { %v1473_v42 = vrot.slane %v1472_v37, 4  ;;  %v1485_v46 = vrot.slane %v1483_v58, 5  ;;  %3105 = vmatmul.mubr.msk.bf16.gmra.mrb[4].mxu0 %vm1243_vm1, %v2852_v17  ;;  %v2948_v33 = vpack.c.bf16 %v1113_v55, %v1113_v55  ;;  %v1111_v2 = vmul.f32 %v778_v57, %v3852_v38 }
  0xce   : > { %v843_v52 = vpop.permute.xlu1 %842  ;;  %v833_v31 = vpop.permute.xlu0 %832  ;;  %v1508_v9 = vshrl.u32 %v2953_v63, 16  ;;  %v1511_v15 = vshll.u32 %v2953_v63, 16  ;;  %3110 = vmatprep.mubr.msk.bf16.mxu0 %vm1243_vm1, %v2985_v47  ;;  %v1459_v5 = vrot.slane %v1458_v30, 4  ;;  %v1500_v13 = vor.u32 %v1499_v11, %v1496_v40 }
  0xcf   : > { %v3972_v7 = vmul.f32 %v843_v52, %v3856_v18  ;;  %v1122_v19 = vmul.f32 %v833_v31, %v3877_v50  ;;  %v1475_v1 = vshll.u32 %v2948_v33, 16  ;;  %v2946_v53 = vpack.c.bf16 %v1111_v2, %v1111_v2 }
  0xd0   : > { %v1524_v61 = vrot.slane %v1522_v59, 4  ;;  %v1527_v28 = vrot.slane %v1525_v27, 5  ;;  %v1486_v37 = vor.u32 %v1485_v46, %v1482_v12  ;;  %v1510_v57 = vrot.slane %v1508_v9, 4 }
  0xd1   : > { %v2959_v38 = vpack.c.bf16 %v3972_v7, %v3972_v7  ;;  %v2944_v49 = vpack.c.bf16 %v3972_v7, %v1122_v19  ;;  %v1477_v58 = vrot.slane %v1475_v1, 5  ;;  %v1461_v21 = vshll.u32 %v2946_v53, 16 }
  0xd2   : > { %v2957_v54 = vpack.c.bf16 %v1122_v19, %v1122_v19  ;;  %v808_v51 = vpop.permute.xlu1 %807  ;;  %v798_v18 = vpop.permute.xlu0 %797  ;;  %v1513_v47 = vrot.slane %v1511_v15, 5  ;;  %v2986_v50 = vpack.c.bf16 %v3943_v48, %v3921_v35  ;;  %v2987_v30 = vpack.c.bf16 %v1122_v19, %v3940_v60  ;;  %v3991_v35 = vld [vmem:[%s4281_s2 + $0x40] sm:$0xff]  }
  0xd3   : > { %3065 = vmatmul.mubr.msk.bf16.gmra.mrb[4].mxu1 %vm1243_vm1, %v2944_v49  ;;  %v1463_v63 = vrot.slane %v1461_v21, 5  ;;  %v1550_v40 = vshrl.u32 %v2959_v38, 16  ;;  %v1553_v11 = vshll.u32 %v2959_v38, 16  ;;  %v1117_v17 = vmul.f32 %v808_v51, %v3882_v14 }
  0xd4   : > { %v1501_v55 = vrot.slane %v1500_v13, 4  ;;  %v1528_v12 = vor.u32 %v1527_v28, %v1524_v61  ;;  %v3985_v59 = vsel %vm3769_vm6, %v1473_v42, %v1477_v58  ;;  %v1115_v27 = vmul.f32 %v798_v18, %v3885_v29 }
  0xd5   : > { %v1464_v60 = vsel %vm3769_vm6, %v1459_v5, %v1463_v63  ;;  %v1536_v48 = vshrl.u32 %v2957_v54, 16  ;;  %v1539_v46 = vshll.u32 %v2957_v54, 16  ;;  %3111 = vmatmul.mubr.msk.bf16.vlgmr.msra.gmra.mrb[0].mxu0 %vm1243_vm1, %v2986_v50  ;;  %v2952_v14 = vpack.c.bf16 %v1117_v17, %v1117_v17  ;;  %v314_v50 = vld [vmem:[%s3460_s28 + $0x110] sm:$0xff]  ;;  %v297_v17 = vld [vmem:[%s3460_s28 + $0x88] sm:$0x1] }
  0xd6   : > { %v828_v33 = vpop.permute.xlu1 %827  ;;  %v818_v2 = vpop.permute.xlu0 %817  ;;  %v1514_v52 = vor.u32 %v1513_v47, %v1510_v57  ;;  %v2950_v42 = vpack.c.bf16 %v1115_v27, %v1115_v27  ;;  %3114 = vmatprep.mubr.msk.bf16.mxu0 %vm1243_vm1, %v2987_v30  ;;  %v1552_v9 = vrot.slane %v1550_v40, 4  ;;  %v1555_v15 = vrot.slane %v1553_v11, 5  ;;  %3119 = vmatpush3.bf16.msra.mxu0 %v3818_v0 }
  0xd7   : > { %v1121_v29 = vmul.f32 %v828_v33, %v3888_v8  ;;  %v1119_v31 = vmul.f32 %v818_v2, %v3891_v23  ;;  %v1503_v19 = vshll.u32 %v2952_v14, 16  ;;  %v2800_v5 = vcombine.low %v1464_v60, %v3985_v59  ;;  %3128 = vmatprep.subr.bf16.mxu0 %v3991_v35 }
  0xd8   : > { %v1487_v13 = vrot.slane %v1486_v37, 4  ;;  %v1489_v1 = vshll.u32 %v2950_v42, 16  ;;  %v1529_v28 = vrot.slane %v1528_v12, 4  ;;  %v1538_v38 = vrot.slane %v1536_v48, 4 }
  0xd9   : > { %v2956_v53 = vpack.c.bf16 %v1121_v29, %v1121_v29  ;;  %v2954_v61 = vpack.c.bf16 %v1119_v31, %v1119_v31  ;;  %v1541_v49 = vrot.slane %v1539_v46, 5  ;;  %v1505_v8 = vrot.slane %v1503_v19, 5  ;;  %3070 = vmatprep.mubr.msk.bf16.mxu1 %vm1243_vm1, %v2800_v5  ;;  %v3226_v46 = vld [vmem:[%s4282_s3] ss:$0 sm:$0xff] }
  0xda   : > { %v848_v23 = vpop.permute.xlu1 %847  ;;  %v838_v58 = vpop.permute.xlu0 %837  ;;  %v1491_v21 = vrot.slane %v1489_v1, 5  ;;  %v1515_v37 = vrot.slane %v1514_v52, 4  ;;  %v1556_v18 = vor.u32 %v1555_v15, %v1552_v9  ;;  %v389_v14 = vmul.f32 %v3226_v46, %v314_v50  ;;  %v342_v9 = vld [vmem:[%s3460_s28 + $0x200] sm:$0xff] }
  0xdb   : > { %v1531_v54 = vshll.u32 %v2956_v53, 16  ;;  %v1517_v51 = vshll.u32 %v2954_v61, 16  ;;  %v1125_v0 = vmul.f32 %v848_v23, %v3936_v20  ;;  %v4006_v57 = vsel %vm3769_vm6, %v1501_v55, %v1505_v8  ;;  %v340_v53 = vld [vmem:[%s3460_s28 + $0x1f0] sm:$0xff] }
  0xdc   : > { %v1123_v47 = vmul.f32 %v838_v58, %v3961_v36  ;;  %v4012_v30 = vsel %vm3769_vm6, %v1487_v13, %v1491_v21  ;;  %v1542_v12 = vor.u32 %v1541_v49, %v1538_v38  ;;  %v372_v52 = vmul.f32 %v3226_v46, %v297_v17 }
  0xdd   : > { %v1533_v63 = vrot.slane %v1531_v54, 5  ;;  %v1519_v40 = vrot.slane %v1517_v51, 5  ;;  %v2960_v11 = vpack.c.bf16 %v1125_v0, %v1125_v0  ;;  %v2801_v20 = vcombine.low %v4012_v30, %v4006_v57 }
  0xde   : > { %v2958_v27 = vpack.c.bf16 %v1123_v47, %v1123_v47  ;;  %v853_v60 = vpop.permute.xlu0 %852  ;;  %v1557_v29 = vrot.slane %v1556_v18, 4  ;;  %v1543_v15 = vrot.slane %v1542_v12, 4  ;;  %v4291_v38 = vpack.c.bf16 %v3643_v45, %v3625_v26  ;;  %v943_v0 = vpop.permute.xlu1 %942  ;;  %v346_v47 = vld [vmem:[%s3460_s28 + $0x220] sm:$0xff] }
  0xdf   : > { %v4019_v55 = vsel %vm3769_vm6, %v1529_v28, %v1533_v63  ;;  %v4023_v36 = vsel %vm3769_vm6, %v1515_v37, %v1519_v40  ;;  %v1559_v48 = vshll.u32 %v2960_v11, 16  ;;  %v1126_v2 = vmul.f32 %v853_v60, %v3966_v56  ;;  %3071 = vmatmul.mubr.msk.bf16.vlgmr.msra.gmra.mrb[0].mxu1 %vm1243_vm1, %v2801_v20  ;;  %v3227_v56 = vld [vmem:[%s4281_s2 + $0x20] sm:$0xff]  }
  0xe0   : > { %v1545_v33 = vshll.u32 %v2958_v27, 16  ;;  %v2802_v42 = vcombine.low %v4023_v36, %v4019_v55  ;;  %3079 = vmatpush3.bf16.msra.mxu1 %v3931_v4  ;;  %v3228_v4 = vld [vmem:[%s4283_s4] ss:$0 sm:$0xff]  ;;  %v417_v28 = vmul.f32 %v3226_v46, %v342_v9  ;;  %v415_v8 = vmul.f32 %v3226_v46, %v340_v53 }
  0xe1   : > { %v1561_v31 = vrot.slane %v1559_v48, 5  ;;  %v2988_v5 = vpack.c.bf16 %v1126_v2, %v3972_v7  ;;  %3138 = vmatprep.subr.bf16.mxu1 %v3227_v56  ;;  %v464_v1 = vadd.f32 %v3228_v4, %v389_v14  ;;  %v447_v61 = vadd.f32 %v3228_v4, %v372_v52 }
  0xe2   : > { %v1547_v19 = vrot.slane %v1545_v33, 5  ;;  %3074 = vmatprep.mubr.msk.bf16.mxu1 %vm1243_vm1, %v2802_v42  ;;  %v492_v21 = vadd.f32 %v3228_v4, %v417_v28  ;;  %v4292_v54 = vpack.c.bf16 %v3670_v6, %v3673_v10  ;;  %v490_v26 = vadd.f32 %v3228_v4, %v415_v8  ;;  %v858_v45 = vpop.permute.xlu0 %857  ;;  %v1073_v48 = vpop.permute.xlu1 %1072 }
  0xe3   : > { %v4041_v13 = vsel %vm3769_vm6, %v1557_v29, %v1561_v31  ;;  %3115 = vmatmul.mubr.msk.bf16.gmra.mrb[4].mxu0 %vm1243_vm1, %v2988_v5  ;;  %v600_v23 = vmul.f32 0.01, %v464_v1  ;;  %vm532_vm3 = vcmp.ge.f32.partialorder %v464_v1, 0.0  ;;  %v583_v58 = vmul.f32 0.01, %v447_v61 }
  0xe4   : > { %v4049_v7 = vsel %vm3769_vm6, %v1543_v15, %v1547_v19  ;;  %3120 = vmatprep.mubr.msk.bf16.mxu0 %vm1243_vm1, %v4291_v38  ;;  %vm515_vm4 = vcmp.ge.f32.partialorder %v447_v61, 0.0  ;;  %v2991_v51 = vpack.c.bf16 %v3804_v34, %v3785_v62  ;;  %v2993_v18 = vpack.c.bf16 %v1126_v2, %v1126_v2  ;;  %v344_v62 = vld [vmem:[%s3460_s28 + $0x210] sm:$0xff]  ;;  %s3205_s28 = smul.u32 80, %s4301_s25 }
  0xe5   : > { %v2803_v49 = vcombine.low %v4049_v7, %v4041_v13  ;;  %v668_v37 = vsel %vm532_vm3, %v464_v1, %v600_v23  ;;  %v651_v50 = vsel %vm515_vm4, %v447_v61, %v583_v58  ;;  %v628_v63 = vmul.f32 0.01, %v492_v21  ;;  %v4175_v58 = vld [vmem:[%s4285_s6] ss:$0 sm:$0xff] }
  0xe6   : > { %v4293_v40 = vpack.c.bf16 %v3788_v16, %v3640_v43  ;;  %vm560_vm5 = vcmp.ge.f32.partialorder %v492_v21, 0.0  ;;  %v1144_v6 = vmul.f32 %v943_v0, %v668_v37  ;;  %vm558_vm7 = vcmp.ge.f32.partialorder %v490_v26, 0.0  ;;  %v1083_v27 = vpop.permute.xlu0 %1082  ;;  %s4105_s14 = scalar_lea.vmem %s4286_s7, %s3205_s28 }
  0xe7   : > { %3075 = vmatmul.mubr.msk.bf16.gmra.mrb[4].mxu1 %vm1243_vm1, %v2803_v49  ;;  %v626_v10 = vmul.f32 0.01, %v490_v26  ;;  %v421_v34 = vmul.f32 %v3226_v46, %v346_v47  ;;  %v2963_v11 = vpack.c.bf16 %v3835_v41, %v3838_v39  ;;  %v2343_v17 = vshrl.u32 %v2993_v18, 16  ;;  %v4170_v49 = vld [vmem:[%s4284_s5] ss:$0 sm:$0xff] }
  0xe8   : > { %3080 = vmatprep.mubr.msk.bf16.mxu1 %vm1243_vm1, %v4292_v54  ;;  %v2346_v12 = vshll.u32 %v2993_v18, 16  ;;  %v1127_v20 = vmul.f32 %v858_v45, %v651_v50  ;;  %v696_v43 = vsel %vm560_vm5, %v492_v21, %v628_v63  ;;  %v4294_v16 = vpack.c.bf16 %v3723_v44, %v3726_v3 }
  0xe9   : > { %v2992_v60 = vpack.c.bf16 %v1144_v6, %v3801_v32  ;;  %v694_v14 = vsel %vm558_vm7, %v490_v26, %v626_v10  ;;  %v496_v41 = vadd.f32 %v3228_v4, %v421_v34  ;;  %v2884_v39 = vcombine.low %v3985_v59, %v4012_v30 }
  0xea   : > { %v2345_v33 = vrot.slane %v2343_v17, 4  ;;  %v2348_v2 = vrot.slane %v2346_v12, 5  ;;  %v2994_v52 = vpack.c.bf16 %v1127_v20, %v1127_v20  ;;  %v1172_v42 = vmul.f32 %v1083_v27, %v696_v43  ;;  %v1103_v5 = vpop.permute.xlu0 %1102 }
  0xeb   : > { %3121 = vmatmul.mubr.msk.bf16.vlgmr.msra.gmra.mrb[0].mxu0 %vm1243_vm1, %v4293_v40  ;;  %v1170_v44 = vmul.f32 %v1073_v48, %v694_v14  ;;  %v2964_v32 = vpack.c.bf16 %v3865_v22, %v3868_v24  ;;  %v632_v9 = vmul.f32 0.01, %v496_v41  ;;  %vm564_vm8 = vcmp.ge.f32.partialorder %v496_v41, 0.0  ;;  %v1093_v24 = vpop.permute.xlu1 %1092 }
  0xec   : > { %3129 = vmatpush3.bf16.msra.mxu0 %v3991_v35  ;;  %3124 = vmatprep.mubr.msk.bf16.mxu0 %vm1243_vm1, %v2991_v51  ;;  %v419_v35 = vmul.f32 %v3226_v46, %v344_v62  ;;  %v2349_v46 = vor.u32 %v2348_v2, %v2345_v33  ;;  %v2352_v29 = vshll.u32 %v2994_v52, 16  ;;  %v2885_v30 = vcombine.low %v4006_v57, %v4023_v36 }
  0xed   : > { %v2967_v31 = vpack.c.bf16 %v1172_v42, %v1170_v44  ;;  %v2886_v22 = vcombine.low %v4019_v55, %v4049_v7  ;;  %vm2645_vm10 = vsmask.f32 7938  ;;  %vm2651_vm12 = vsmask.f32 256 }
  0xee   : > { %v494_v3 = vadd.f32 %v3228_v4, %v419_v35  ;;  %v2350_v15 = vrot.slane %v2349_v46, 4  ;;  %v2354_v19 = vrot.slane %v2352_v29, 5 }
  0xef   : > { %3081 = vmatmul.mubr.msk.bf16.vlgmr.msra.gmra.mrb[0].mxu1 %vm1243_vm1, %v4294_v16 }
  0xf0   : > { %3084 = vmatprep.mubr.msk.bf16.mxu1 %vm1243_vm1, %v2963_v11  ;;  %3139 = vmatpush3.bf16.msra.mxu1 %v3227_v56  ;;  %v630_v59 = vmul.f32 0.01, %v494_v3  ;;  %vm562_vm9 = vcmp.ge.f32.partialorder %v494_v3, 0.0  ;;  %v700_v56 = vsel %vm564_vm8, %v496_v41, %v632_v9  ;;  %v2355_v53 = vsel %vm3769_vm6, %v2350_v15, %v2354_v19 }
  0xf1   : > { %v1176_v1 = vmul.f32 %v1103_v5, %v700_v56  ;;  %v2887_v61 = vcombine.low %v4041_v13, %v2355_v53  ;;  %vm2511_vm6 = vcmask 253952  }
  0xf2   : > { %v698_v4 = vsel %vm562_vm9, %v494_v3, %v630_v59  ;;  %2512 = vst.msk [vmem:[%s4105_s14 + $0x4] sm:$0x1] %vm2511_vm6, %v4295_v25  ;;  %2518 = vst.msk [vmem:[%s4105_s14 + $0x1c] sm:$0x1] %vm2511_vm6, %v4295_v25 }
  0xf3   : > { %3125 = vmatmul.mubr.msk.bf16.gmra.mrb[4].mxu0 %vm1243_vm1, %v2992_v60  ;;  %v1174_v57 = vmul.f32 %v1093_v24, %v698_v4  ;;  %2530 = vst.msk [vmem:[%s4105_s14 + $0x4c] sm:$0x1] %vm2511_vm6, %v4295_v25  ;;  %2514 = vst.msk [vmem:[%s4105_s14 + $0xc] sm:$0x1] %vm2511_vm6, %v4295_v25 }
  0xf4   : > { %3130 = vmatprep.mubr.msk.bf16.mxu0 %vm1243_vm1, %v2884_v39  ;;  %2516 = vst.msk [vmem:[%s4105_s14 + $0x14] sm:$0x1] %vm2511_vm6, %v4295_v25  ;;  %2520 = vst.msk [vmem:[%s4105_s14 + $0x24] sm:$0x1] %vm2511_vm6, %v4295_v25 }
  0xf5   : > { %v2968_v36 = vpack.c.bf16 %v1176_v1, %v1174_v57  ;;  %2522 = vst.msk [vmem:[%s4105_s14 + $0x2c] sm:$0x1] %vm2511_vm6, %v4295_v25  ;;  %2524 = vst.msk [vmem:[%s4105_s14 + $0x34] sm:$0x1] %vm2511_vm6, %v4295_v25 }
  0xf6   : > { %2526 = vst.msk [vmem:[%s4105_s14 + $0x3c] sm:$0x1] %vm2511_vm6, %v4295_v25  ;;  %2528 = vst.msk [vmem:[%s4105_s14 + $0x44] sm:$0x1] %vm2511_vm6, %v4295_v25 }
  0xf7   : > { %3085 = vmatmul.mubr.msk.bf16.gmra.mrb[4].mxu1 %vm1243_vm1, %v2964_v32  ;;  %vm4202_vm2 = vmand %vm2511_vm6, %vm2651_vm12 }
  0xf8   : > { %3094 = vmatprep.mubr.msk.bf16.mxu1 %vm1243_vm1, %v2967_v31 }
  0xf9   : > { %v2913_v5 = vld [vmem:[%s4105_s14 + $0x1c] sm:$0x1] }
  0xfb   : > { %3131 = vmatmul.mubr.msk.bf16.vlgmr.msra.gmra.mrb[0].mxu0 %vm1243_vm1, %v2885_v30 }
  0xfc   : > { %3134 = vmatprep.mubr.msk.bf16.mxu0 %vm1243_vm1, %v2886_v22 }
 0x103   : > { %3095 = vmatmul.mubr.msk.bf16.vlgmr.msra.gmra.mrb[4].mxu1 %vm1243_vm1, %v2968_v36  ;;  %3135 = vmatmul.mubr.msk.bf16.gmra.mrb[4].mxu0 %vm1243_vm1, %v2887_v61  ;;  %vm2509_vm1 = vcmask 257024  }
 0x104   : > { %2510 = vst.msk [vmem:[%s4105_s14] sm:$0xf] %vm2509_vm1, %v4295_v25  ;;  %2517 = vst.msk [vmem:[%s4105_s14 + $0x18] sm:$0xf] %vm2509_vm1, %v4295_v25 }
 0x105   : > { %2529 = vst.msk [vmem:[%s4105_s14 + $0x48] sm:$0xf] %vm2509_vm1, %v4295_v25  ;;  %2513 = vst.msk [vmem:[%s4105_s14 + $0x8] sm:$0xf] %vm2509_vm1, %v4295_v25 }
 0x106   : > { %2515 = vst.msk [vmem:[%s4105_s14 + $0x10] sm:$0xf] %vm2509_vm1, %v4295_v25  ;;  %2519 = vst.msk [vmem:[%s4105_s14 + $0x20] sm:$0xf] %vm2509_vm1, %v4295_v25 }
 0x107   : > { %2521 = vst.msk [vmem:[%s4105_s14 + $0x28] sm:$0xf] %vm2509_vm1, %v4295_v25  ;;  %2523 = vst.msk [vmem:[%s4105_s14 + $0x30] sm:$0xf] %vm2509_vm1, %v4295_v25 }
 0x108   : > { %2525 = vst.msk [vmem:[%s4105_s14 + $0x38] sm:$0xf] %vm2509_vm1, %v4295_v25  ;;  %2527 = vst.msk [vmem:[%s4105_s14 + $0x40] sm:$0xf] %vm2509_vm1, %v4295_v25 }
 0x109   : > { %vm4194_vm0 = vmand %vm2509_vm1, %vm2645_vm10 }
 0x10b   : > { %v2911_v29 = vld [vmem:[%s4105_s14 + $0x18] sm:$0xf] }
 0x10c   : > { %v2903_v53 = vld [vmem:[%s4105_s14 + $0x8] sm:$0xf] }
 0x1c2   : > { %v3082_v55 = vpop.f32.mrb[0].mxu1 }
 0x1c3   : > { %v1744_v13 = vpop.f32.mrb[1].mxu1 }
 0x1c4   : > { %v3083_v7 = vpop.f32.mrb[2].mxu1 }
 0x1c5   : > { %v1747_v28 = vpop.f32.mrb[3].mxu1 }
 0x1ce   : > { %v3132_v38 = vpop.f32.mrb[0].mxu0 }
 0x1cf   : > { %v3140_v8 = vadd.f32 %v3132_v38, %v3082_v55  ;;  %v2416_v23 = vpop.f32.mrb[1].mxu0  ;;  %v2905_v55 = vld [vmem:[%s4105_s14 + $0xc] sm:$0x1] }
 0x1d0   : > { %v3141_v21 = vadd.f32 %v2416_v23, %v1744_v13  ;;  %v3133_v54 = vpop.f32.mrb[2].mxu0  ;;  %v2917_v23 = vld [vmem:[%s4105_s14 + $0x24] sm:$0x1] }
 0x1d1   : > { %v2464_v26 = vmul.f32 %v3140_v8, %v4170_v49  ;;  %v3142_v45 = vadd.f32 %v3133_v54, %v3083_v7  ;;  %v2419_v51 = vpop.f32.mrb[3].mxu0  ;;  %v2915_v8 = vld [vmem:[%s4105_s14 + $0x20] sm:$0xf] }
 0x1d2   : > { %v2462_v0 = vmul.f32 %v3141_v21, %v4170_v49  ;;  %v3143_v37 = vadd.f32 %v2419_v51, %v1747_v28 }
 0x1d3   : > { %v2479_v18 = vadd.f32 %v4175_v58, %v2464_v26  ;;  %v2465_v47 = vmul.f32 %v3142_v45, %v4170_v49 }
 0x1d4   : > { %v2477_v50 = vadd.f32 %v4175_v58, %v2462_v0  ;;  %v2463_v63 = vmul.f32 %v3143_v37, %v4170_v49  ;;  %v2907_v37 = vld [vmem:[%s4105_s14 + $0x10] sm:$0xf] }
 0x1d5   : > { %vm2487_vm11 = vcmp.ge.f32.partialorder %v2479_v18, 0.0  ;;  %v2495_v40 = vmul.f32 0.01, %v2479_v18  ;;  %v2480_v6 = vadd.f32 %v4175_v58, %v2465_v47 }
 0x1d6   : > { %vm2485_vm13 = vcmp.ge.f32.partialorder %v2477_v50, 0.0  ;;  %v2493_v10 = vmul.f32 0.01, %v2477_v50  ;;  %v2478_v62 = vadd.f32 %v4175_v58, %v2463_v63  ;;  %v3096_v34 = vpop.f32.mrb[4].mxu1  ;;  %v3136_v11 = vpop.f32.mrb[4].mxu0 }
 0x1d7   : > { %v2503_v17 = vsel %vm2487_vm11, %v2479_v18, %v2495_v40  ;;  %vm2488_vm14 = vcmp.ge.f32.partialorder %v2480_v6, 0.0  ;;  %v2496_v12 = vmul.f32 0.01, %v2480_v6  ;;  %v1874_v20 = vpop.f32.mrb[5].mxu1  ;;  %v3144_v27 = vadd.f32 %v3136_v11, %v3096_v34  ;;  %v2432_v43 = vpop.f32.mrb[5].mxu0 }
 0x1d8   : > { %v2997_v16 = vpack.c.bf16 %v2503_v17, %v2503_v17  ;;  %v2501_v35 = vsel %vm2485_vm13, %v2477_v50, %v2493_v10  ;;  %vm2486_vm15 = vcmp.ge.f32.partialorder %v2478_v62, 0.0  ;;  %v2494_v60 = vmul.f32 0.01, %v2478_v62  ;;  %v4185_v48 = vpop.f32.mrb[6].mxu1  ;;  %v4187_v14 = vpop.f32.mrb[6].mxu0 }
 0x1d9   : > { %v2995_v41 = vpack.c.bf16 %v2501_v35, %v2501_v35  ;;  %v2504_v39 = vsel %vm2488_vm14, %v2480_v6, %v2496_v12  ;;  %v2468_v33 = vmul.f32 %v3144_v27, %v4170_v49  ;;  %v3145_v2 = vadd.f32 %v2432_v43, %v1874_v20  ;;  %v1877_v52 = vpop.f32.mrb[7].mxu1  ;;  %v2435_v42 = vpop.f32.mrb[7].mxu0  ;;  %v2909_v18 = vld [vmem:[%s4105_s14 + $0x14] sm:$0x1] }
 0x1da   : > { %v2580_v44 = vshrl.u32 %v2997_v16, 16  ;;  %v2583_v3 = vshll.u32 %v2997_v16, 16  ;;  %v2998_v32 = vpack.c.bf16 %v2504_v39, %v2504_v39  ;;  %v2502_v46 = vsel %vm2486_vm15, %v2478_v62, %v2494_v60 }
 0x1db   : > { %v2564_v31 = vshrl.u32 %v2995_v41, 16  ;;  %v2567_v9 = vshll.u32 %v2995_v41, 16  ;;  %v2996_v59 = vpack.c.bf16 %v2502_v46, %v2502_v46  ;;  %v2483_v30 = vadd.f32 %v4175_v58, %v2468_v33 }
 0x1dc   : > { %v2582_v15 = vrot.slane %v2580_v44, 7  ;;  %v2588_v56 = vshrl.u32 %v2998_v32, 16  ;;  %v2591_v22 = vshll.u32 %v2998_v32, 16  ;;  %v2466_v24 = vmul.f32 %v3145_v2, %v4170_v49  ;;  %v2927_v2 = vld [vmem:[%s4105_s14 + $0x38] sm:$0xf] }
 0x1dd   : > { %v2566_v1 = vrot.slane %v2564_v31, 7  ;;  %v2572_v57 = vshrl.u32 %v2996_v59, 16  ;;  %v2575_v36 = vshll.u32 %v2996_v59, 16  ;;  %vm2491_vm3 = vcmp.ge.f32.partialorder %v2483_v30, 0.0  ;;  %v2929_v44 = vld [vmem:[%s4105_s14 + $0x3c] sm:$0x1] }
 0x1de   : > { %v2585_v61 = vor.u32 %v2583_v3, %v2582_v15  ;;  %v2586_v25 = vrot.slane %v2582_v15, 4  ;;  %v2590_v13 = vrot.slane %v2588_v56, 7  ;;  %v2499_v7 = vmul.f32 0.01, %v2483_v30  ;;  %v2921_v59 = vld [vmem:[%s4105_s14 + $0x2c] sm:$0x1] }
 0x1df   : > { %v2569_v28 = vor.u32 %v2567_v9, %v2566_v1  ;;  %v2570_v38 = vrot.slane %v2566_v1, 4  ;;  %v2574_v21 = vrot.slane %v2572_v57, 7  ;;  %v2481_v54 = vadd.f32 %v4175_v58, %v2466_v24  ;;  %v2919_v9 = vld [vmem:[%s4105_s14 + $0x28] sm:$0xf] }
 0x1e0   : > { %v2663_v26 = vsel %vm4194_vm0, %v2585_v61, %v2911_v29  ;;  %v2666_v45 = vsel %vm4202_vm2, %v2586_v25, %v2913_v5  ;;  %v2593_v51 = vor.u32 %v2591_v22, %v2590_v13  ;;  %v2594_v0 = vrot.slane %v2590_v13, 4  ;;  %v2933_v13 = vld [vmem:[%s4105_s14 + $0x44] sm:$0x1] }
 0x1e1   : > { %2912 = vst [vmem:[%s4105_s14 + $0x18] sm:$0xf] %v2663_v26  ;;  %2914 = vst [vmem:[%s4105_s14 + $0x1c] sm:$0x1] %v2666_v45  ;;  %v2648_v47 = vsel %vm4194_vm0, %v2569_v28, %v2903_v53  ;;  %v2654_v50 = vsel %vm4202_vm2, %v2570_v38, %v2905_v55  ;;  %v2577_v63 = vor.u32 %v2575_v36, %v2574_v21  ;;  %v2578_v40 = vrot.slane %v2574_v21, 4 }
 0x1e2   : > { %2904 = vst [vmem:[%s4105_s14 + $0x8] sm:$0xf] %v2648_v47  ;;  %2906 = vst [vmem:[%s4105_s14 + $0xc] sm:$0x1] %v2654_v50  ;;  %v2669_v6 = vsel %vm4194_vm0, %v2593_v51, %v2915_v8  ;;  %v2672_v10 = vsel %vm4202_vm2, %v2594_v0, %v2917_v23  ;;  %v2507_v62 = vsel %vm2491_vm3, %v2483_v30, %v2499_v7  ;;  %vm2489_vm4 = vcmp.ge.f32.partialorder %v2481_v54, 0.0 }
 0x1e3   : > { %2916 = vst [vmem:[%s4105_s14 + $0x20] sm:$0xf] %v2669_v6  ;;  %2918 = vst [vmem:[%s4105_s14 + $0x24] sm:$0x1] %v2672_v10  ;;  %v2657_v34 = vsel %vm4194_vm0, %v2577_v63, %v2907_v37  ;;  %v2660_v11 = vsel %vm4202_vm2, %v2578_v40, %v2909_v18  ;;  %v3001_v17 = vpack.c.bf16 %v2507_v62, %v2507_v62  ;;  %v2497_v12 = vmul.f32 0.01, %v2481_v54 }
 0x1e4   : > { %2908 = vst [vmem:[%s4105_s14 + $0x10] sm:$0xf] %v2657_v34  ;;  %2910 = vst [vmem:[%s4105_s14 + $0x14] sm:$0x1] %v2660_v11  ;;  %v3146_v20 = vadd.f32 %v4187_v14, %v4185_v48  ;;  %v3147_v27 = vadd.f32 %v2435_v42, %v1877_v52  ;;  %v2931_v55 = vld [vmem:[%s4105_s14 + $0x40] sm:$0xf] }
 0x1e5   : > { %v2612_v43 = vshrl.u32 %v3001_v17, 16  ;;  %v2505_v16 = vsel %vm2489_vm4, %v2481_v54, %v2497_v12  ;;  %v2615_v33 = vshll.u32 %v3001_v17, 16  ;;  %v2923_v23 = vld [vmem:[%s4105_s14 + $0x30] sm:$0xf]  ;;  %v2925_v21 = vld [vmem:[%s4105_s14 + $0x34] sm:$0x1] }
 0x1e6   : > { %v2999_v35 = vpack.c.bf16 %v2505_v16, %v2505_v16  ;;  %v2469_v60 = vmul.f32 %v3146_v20, %v4170_v49  ;;  %v2467_v41 = vmul.f32 %v3147_v27, %v4170_v49 }
 0x1e7   : > { %v2614_v39 = vrot.slane %v2612_v43, 7 }
 0x1e8   : > { %v2596_v3 = vshrl.u32 %v2999_v35, 16  ;;  %v2484_v32 = vadd.f32 %v4175_v58, %v2469_v60  ;;  %v2482_v48 = vadd.f32 %v4175_v58, %v2467_v41  ;;  %v2599_v42 = vshll.u32 %v2999_v35, 16 }
 0x1e9   : > { %v2617_v14 = vor.u32 %v2615_v33, %v2614_v39  ;;  %v2618_v52 = vrot.slane %v2614_v39, 4 }
 0x1ea   : > { %v2598_v46 = vrot.slane %v2596_v3, 7  ;;  %vm2492_vm5 = vcmp.ge.f32.partialorder %v2484_v32, 0.0  ;;  %v2500_v29 = vmul.f32 0.01, %v2484_v32  ;;  %vm2490_vm7 = vcmp.ge.f32.partialorder %v2482_v48, 0.0 }
 0x1eb   : > { %v2687_v49 = vsel %vm4194_vm0, %v2617_v14, %v2927_v2  ;;  %v2690_v31 = vsel %vm4202_vm2, %v2618_v52, %v2929_v44  ;;  %v2498_v30 = vmul.f32 0.01, %v2482_v48 }
 0x1ec   : > { %2928 = vst [vmem:[%s4105_s14 + $0x38] sm:$0xf] %v2687_v49  ;;  %2930 = vst [vmem:[%s4105_s14 + $0x3c] sm:$0x1] %v2690_v31  ;;  %v2601_v58 = vor.u32 %v2599_v42, %v2598_v46  ;;  %v2602_v15 = vrot.slane %v2598_v46, 4  ;;  %v2508_v5 = vsel %vm2492_vm5, %v2484_v32, %v2500_v29 }
 0x1ed   : > { %v3002_v56 = vpack.c.bf16 %v2508_v5, %v2508_v5  ;;  %v2506_v22 = vsel %vm2490_vm7, %v2482_v48, %v2498_v30 }
 0x1ee   : > { %v2675_v24 = vsel %vm4194_vm0, %v2601_v58, %v2919_v9  ;;  %v2678_v1 = vsel %vm4202_vm2, %v2602_v15, %v2921_v59  ;;  %v3000_v53 = vpack.c.bf16 %v2506_v22, %v2506_v22 }
 0x1ef   : > { %2920 = vst [vmem:[%s4105_s14 + $0x28] sm:$0xf] %v2675_v24  ;;  %2922 = vst [vmem:[%s4105_s14 + $0x2c] sm:$0x1] %v2678_v1  ;;  %v2620_v57 = vshrl.u32 %v3002_v56, 16  ;;  %v2623_v25 = vshll.u32 %v3002_v56, 16 }
 0x1f0   : > { %v2604_v36 = vshrl.u32 %v3000_v53, 16  ;;  %v2607_v28 = vshll.u32 %v3000_v53, 16 }
 0x1f1   : > { %v2622_v61 = vrot.slane %v2620_v57, 7 }
 0x1f2   : > { %v2606_v7 = vrot.slane %v2604_v36, 7 }
 0x1f3   : > { %v2625_v38 = vor.u32 %v2623_v25, %v2622_v61  ;;  %v2626_v8 = vrot.slane %v2622_v61, 4 }
 0x1f4   : > { %v2609_v54 = vor.u32 %v2607_v28, %v2606_v7  ;;  %v2610_v26 = vrot.slane %v2606_v7, 4 }
 0x1f5   : > { %v2693_v45 = vsel %vm4194_vm0, %v2625_v38, %v2931_v55  ;;  %v2696_v51 = vsel %vm4202_vm2, %v2626_v8, %v2933_v13 }
 0x1f6   : > { %2932 = vst [vmem:[%s4105_s14 + $0x40] sm:$0xf] %v2693_v45  ;;  %2934 = vst [vmem:[%s4105_s14 + $0x44] sm:$0x1] %v2696_v51  ;;  %v2681_v0 = vsel %vm4194_vm0, %v2609_v54, %v2923_v23  ;;  %v2684_v37 = vsel %vm4202_vm2, %v2610_v26, %v2925_v21 }
 0x1f7   : > { %2924 = vst [vmem:[%s4105_s14 + $0x30] sm:$0xf] %v2681_v0  ;;  %2926 = vst [vmem:[%s4105_s14 + $0x34] sm:$0x1] %v2684_v37 }
 0x1f8 PF: > { %s17_s24 = sadd.s32 1, %s3235_s24  }
 0x1f9   : > { %p14_p4 = scmp.ge.s32.totalorder %s17_s24, 4  }
 0x1fb   :  { %16 = sbr.rel (!%p14_p4) target bundleno = 1 (0x1), region = 87 }

</bundles_post_ra>
